<compile_context>
chip_gen: v7x
topology: tpu7x:2x2x1
jax: 0.10.0
libtpu: 0.0.40
codegen_flags: <defaults>
</compile_context>

<pallas_src>
import jax
import jax.numpy as jnp
from jax.experimental import pallas as pl
from jax.experimental.pallas import tpu as pltpu

IN_FEATURES = 1024
OUT_FEATURES = 10
OUT_PAD = 128            # lane-dense output width (pad 10 -> 128 lanes, full vst)
TM_MAX = 2048            # max rows per batch tile (8 MiB f32 per x tile)
ROW_ALIGN = 8            # f32 sublane multiple (would be 16 for a bf16 x stream)


def _round_up(n: int, m: int) -> int:
    return ((n + m - 1) // m) * m


def _choose_tiling(batch_rows: int):
    """Pick (tm, padded_rows) so padding waste < tm, and use an even number of
    tiles (>= 2) when the batch allows it so both v7x TensorCores get work."""
    rows = _round_up(max(batch_rows, 1), ROW_ALIGN)
    n_tiles = pl.cdiv(rows, TM_MAX)
    if rows >= 2 * ROW_ALIGN:
        n_tiles = max(n_tiles, 2)
    if n_tiles > 1 and n_tiles % 2:
        n_tiles += 1                      # even split for megacore
    tm = _round_up(pl.cdiv(rows, n_tiles), ROW_ALIGN)
    rows_pad = _round_up(rows, tm)
    return tm, rows_pad


def linear_kernel(x_ref, wt_ref, b_ref, o_ref):
    # x_ref: (tm, 1024)  wt_ref: (1024, 128)  b_ref: (1, 128)  o_ref: (tm, 128)
    acc = jnp.dot(
        x_ref[...], wt_ref[...],
        preferred_element_type=jnp.float32,
        precision=jax.lax.Precision.HIGHEST,   # exact f32 parity; free (HBM-bound)
    )
    o_ref[...] = (acc + b_ref[...].astype(jnp.float32)).astype(o_ref.dtype)


def prepare_params(weight, bias):
    """Hoisted out of the hot path: transpose + lane-pad the parameters ONCE."""
    wt = jnp.pad(weight.T, ((0, 0), (0, OUT_PAD - OUT_FEATURES)))           # (1024, 128)
    b2d = jnp.pad(bias, (0, OUT_PAD - OUT_FEATURES)).reshape(1, OUT_PAD)    # (1, 128)
    return wt, b2d


def linear_forward_padded(x, wt_padded, bias_padded):
    """Runs the kernel and returns the lane/row-padded (rows_pad, 128) output.
    Consumers that can ignore the padding avoid an extra HBM pass over the
    result. Padded rows hold `bias`, not zero -- ignore rows >= x.shape[0]."""
    B = x.shape[0]
    x2d = x.reshape(B, -1)                              # torch.flatten(x, start_dim=1)
    assert x2d.shape[1] == IN_FEATURES

    tm, rows_pad = _choose_tiling(B)
    if rows_pad != B:
        x2d = jnp.pad(x2d, ((0, rows_pad - B), (0, 0)))

    itemsize = jnp.dtype(x2d.dtype).itemsize
    grid = (rows_pad // tm,)

    return pl.pallas_call(
        linear_kernel,
        out_shape=jax.ShapeDtypeStruct((rows_pad, OUT_PAD), x2d.dtype),
        grid=grid,
        in_specs=[
            pl.BlockSpec((tm, IN_FEATURES), lambda i: (i, 0)),        # streamed tiles
            pl.BlockSpec((IN_FEATURES, OUT_PAD), lambda i: (0, 0)),   # VMEM-resident
            pl.BlockSpec((1, OUT_PAD), lambda i: (0, 0)),             # VMEM-resident
        ],
        out_specs=pl.BlockSpec((tm, OUT_PAD), lambda i: (i, 0)),
        compiler_params=pltpu.CompilerParams(
            dimension_semantics=("parallel",),
            vmem_limit_bytes=32 * 1024 * 1024,   # TM_MAX tiles fit on v5e/v6e/v7x
        ),
        cost_estimate=pl.CostEstimate(
            flops=2 * rows_pad * IN_FEATURES * OUT_PAD,
            bytes_accessed=(rows_pad * IN_FEATURES * itemsize
                            + IN_FEATURES * OUT_PAD * itemsize
                            + rows_pad * OUT_PAD * itemsize),
            transcendentals=0,
        ),
    )(x2d, wt_padded, bias_padded)


def linear_forward(x, weight, bias):
    """Module-semantics entry point: flatten(x, 1) @ W.T + b -> (B, 10)."""
    # TODO(synk): in a real model, call prepare_params() once at init and reuse
    # the padded parameters across calls instead of re-deriving them here.
    wt, b2d = prepare_params(weight, bias)
    out_pad = linear_forward_padded(x, wt, b2d)
    # Final slice kept only to match nn.Linear's exact (B, 10) output shape;
    # hot-path consumers should use linear_forward_padded() and skip this pass.
    return out_pad[: x.shape[0], :OUT_FEATURES]


if __name__ == "__main__":
    key = jax.random.PRNGKey(0)
    kx, kw, kb = jax.random.split(key, 3)

    # Input consistent with flatten -> 1024 features: (B=2, C=4, H=16, W=16)
    x = jax.random.normal(kx, (2, 4, 16, 16), dtype=jnp.float32)

    # Deterministic parameter init (matches torch.nn.Linear's U(-1/sqrt(in), 1/sqrt(in)))
    bound = 1.0 / (IN_FEATURES ** 0.5)
    weight = jax.random.uniform(kw, (OUT_FEATURES, IN_FEATURES),
                                minval=-bound, maxval=bound, dtype=jnp.float32)
    bias = jax.random.uniform(kb, (OUT_FEATURES,),
                              minval=-bound, maxval=bound, dtype=jnp.float32)

    out = linear_forward(x, weight, bias)
    jax.block_until_ready(out)

    # Reference check in plain JAX
    ref = x.reshape(x.shape[0], -1) @ weight.T + bias
    assert out.shape == (2, OUT_FEATURES)
    assert jnp.allclose(out, ref, atol=1e-4, rtol=1e-4)

    print("KERNEL_OK")
</pallas_src>

<mosaic_0001>
module attributes {stable_mosaic.version = 11 : i64} {
  func.func @linear_kernel(%arg0: i32, %arg1: memref<8x1024xf32, #tpu.memory_space<vmem>>, %arg2: memref<1024x128xf32, #tpu.memory_space<vmem>>, %arg3: memref<1x128xf32, #tpu.memory_space<vmem>>, %arg4: memref<8x128xf32, #tpu.memory_space<vmem>>) attributes {dimension_semantics = [#tpu.dimension_semantics<parallel>], iteration_bounds = array<i64: 1>, scalar_prefetch = 0 : i64, scratch_operands = 0 : i64, tpu.core_type = #tpu.core_type<tc>, window_params = [{transform_indices = @transform_0, window_bounds = array<i64: 8, 1024>}, {pipeline_mode = #tpu.pipeline_mode<synchronous>, transform_indices = @transform_1, window_bounds = array<i64: 1024, 128>}, {pipeline_mode = #tpu.pipeline_mode<synchronous>, transform_indices = @transform_2, window_bounds = array<i64: 1, 128>}, {transform_indices = @transform_3, window_bounds = array<i64: 8, 128>}]} {
    %c0 = arith.constant 0 : index
    %c0_0 = arith.constant 0 : index
    %0 = vector.load %arg1[%c0, %c0_0] : memref<8x1024xf32, #tpu.memory_space<vmem>>, vector<8x1024xf32>
    %c0_1 = arith.constant 0 : index
    %c0_2 = arith.constant 0 : index
    %1 = vector.load %arg2[%c0_1, %c0_2] : memref<1024x128xf32, #tpu.memory_space<vmem>>, vector<1024x128xf32>
    %cst = arith.constant dense<0.000000e+00> : vector<8x128xf32>
    %2 = tpu.matmul %0, %1, %cst {dimension_numbers = #tpu.dot_dimension_numbers<[1], [0], [0], [1], [0, 0, 1, 1], [], []>, precision = #tpu.contract_precision<fp32>} : vector<8x1024xf32>, vector<1024x128xf32>, vector<8x128xf32> -> vector<8x128xf32>
    %c0_3 = arith.constant 0 : index
    %c0_4 = arith.constant 0 : index
    %3 = vector.load %arg3[%c0_3, %c0_4] : memref<1x128xf32, #tpu.memory_space<vmem>>, vector<1x128xf32>
    %4 = vector.broadcast %3 : vector<1x128xf32> to vector<8x128xf32>
    %5 = arith.addf %2, %4 : vector<8x128xf32>
    %c0_5 = arith.constant 0 : index
    %c0_6 = arith.constant 0 : index
    %6 = vector.load %arg4[%c0_5, %c0_6] : memref<8x128xf32, #tpu.memory_space<vmem>>, vector<8x128xf32>
    tpu.vector_store %arg4[%c0_5, %c0_6], %5 {strides = array<i32>} : memref<8x128xf32, #tpu.memory_space<vmem>>, vector<8x128xf32>,
    return
  }
  func.func @transform_0(%arg0: i32) -> (i32, i32) {
    %c0_i32 = arith.constant 0 : i32
    %c0_i32_0 = arith.constant 0 : i32
    return %arg0, %c0_i32 : i32, i32
  }
  func.func @transform_1(%arg0: i32) -> (i32, i32) {
    %c0_i32 = arith.constant 0 : i32
    %c0_i32_0 = arith.constant 0 : i32
    %c0_i32_1 = arith.constant 0 : i32
    return %c0_i32, %c0_i32_0 : i32, i32
  }
  func.func @transform_2(%arg0: i32) -> (i32, i32) {
    %c0_i32 = arith.constant 0 : i32
    %c0_i32_0 = arith.constant 0 : i32
    %c0_i32_1 = arith.constant 0 : i32
    return %c0_i32, %c0_i32_0 : i32, i32
  }
  func.func @transform_3(%arg0: i32) -> (i32, i32) {
    %c0_i32 = arith.constant 0 : i32
    %c0_i32_0 = arith.constant 0 : i32
    return %arg0, %c0_i32 : i32, i32
  }
}

</mosaic_0001>

<bundles_post_ra>
// kernel: tpu_custom_call.1
= control target key start
LH: loop header
LB: loop body
LE: loop exit
PB: predicated region body
PF: predicated region fallthrough
CT: control target
= control target key end

     0   :  { %8 = vsyncpa [#allocation3], 0  ;;  %s7230_s0 = inlined_call_operand.hbm [shape: f32[8,1024], index: 0, kind: input, shape index: {}]   ;;  %s7231_s1 = inlined_call_operand.hbm [shape: f32[1024,128], index: 1, kind: input, shape index: {}]   ;;  %s7232_s2 = inlined_call_operand.vmem [shape: f32[1,128], index: 2, kind: input, shape index: {}]   ;;  %s7233_s3 = inlined_call_operand.hbm [shape: f32[8,128], index: 3, kind: output, shape index: {}]  }
   0x1   :  { %9 = vsyncpa [#allocation6], 0 }
   0x2   :  { %10 = vsyncpa [#allocation4], 0  ;;  %s5335_s12 = smov [#allocation2]   ;;  %s5336_s14 = smov [#allocation5]  }
   0x3   :  { %s17_s13 = sshll.u32 %s5335_s12, 4  ;;  %s26_s15 = sshll.u32 %s5336_s14, 4  ;;  %s18_s13 = int_to_ptr.vmem [resolvable:$true] %s17_s13  ;;  %s5360_s15 = int_to_ptr.vmem [resolvable:$true] %s26_s15 }
   0x4   :  { %s5263_s18 = scalar_lea.hbm %s7230_s0, 1024 }
   0x5   :  { %p5264_p0 = scmp.ne.s32.totalorder %s7230_s0, %s5263_s18  ;;  %p5267_p1 = scmp.lt.u32.totalorder %s5263_s18, %s7230_s0 }
   0x7   :  { %p5269_p2 = pnand %p5267_p1, %p5264_p0 }
   0x9   :  { %5272 = shalt.err (!%p5269_p2)
}
   0xa   :  { %s5273_s23 = scalar_lea.vmem %s18_s13, 1024  ;;  %p5278_p4 = scmp.lt.s32.totalorder %s18_s13, %s18_s13 }
   0xb   :  { %p5274_p3 = scmp.ne.s32.totalorder %s18_s13, %s5273_s23  ;;  %p5279_p5 = scmp.lt.s32.totalorder %s5273_s23, %s5273_s23 }
   0xd   :  { %p5280_p6 = por %p5279_p5, %p5278_p4 }
   0xf   :  { %p5281_p7 = pnand %p5280_p6, %p5274_p3 }
  0x11   :  { %5284 = shalt.err (!%p5281_p7)
}
  0x12   :  { %20 = dma.hbm_to_vmem [thread:$0]  %s7230_s0, 1024, %s18_s13, [#allocation3]  }
  0x13   :  { %s5285_s28 = scalar_lea.hbm %s7231_s1, 16384 }
  0x14   :  { %p5286_p8 = scmp.ne.s32.totalorder %s7231_s1, %s5285_s28  ;;  %p5289_p9 = scmp.lt.u32.totalorder %s5285_s28, %s7231_s1 }
  0x16   :  { %p5291_p10 = pnand %p5289_p9, %p5286_p8 }
  0x18   :  { %5294 = shalt.err (!%p5291_p10)
}
  0x19   :  { %s5295_s6 = scalar_lea.vmem %s5360_s15, 16384  ;;  %p5300_p12 = scmp.lt.s32.totalorder %s5360_s15, %s5360_s15 }
  0x1a   :  { %p5296_p11 = scmp.ne.s32.totalorder %s5360_s15, %s5295_s6  ;;  %p5301_p13 = scmp.lt.s32.totalorder %s5295_s6, %s5295_s6 }
  0x1c   :  { %p5302_p0 = por %p5301_p13, %p5300_p12 }
  0x1e   :  { %p5303_p1 = pnand %p5302_p0, %p5296_p11 }
  0x20   :  { %5306 = shalt.err (!%p5303_p1)
}
  0x21   :  { %s5337_s0 = smov 128   ;;  %s5338_s7 = smov 8  }
  0x22   :  { %32 = dma.hbm_to_vmem [thread:$0]  %s7231_s1, 16384, %s5360_s15, [#allocation6], %s5337_s0, %s5337_s0, %s5338_s7  }
  0x23   :  { %5329 = dma.done.wait [#allocation3], 1024  }
  0x24   :  { %5330 = vsyncadd [#allocation3], 4294966272 }
  0x25   :  { %5331 = dma.done.wait [#allocation6], 16384  }
  0x26   :  { %5332 = vsyncadd [#allocation6], 4294950912  ;;  %v65_v0 = vld [vmem:[#allocation5 + $0x80] sm:$0xff]  ;;  %v66_v1 = vld [vmem:[#allocation5 + $0x88] sm:$0xff] }
  0x27   :  { %v49_v2 = vld [vmem:[#allocation5] sm:$0xff]  ;;  %v233_v3 = vand.u32 4294901760, %v65_v0  ;;  %v236_v4 = vand.u32 4294901760, %v66_v1  ;;  %v50_v5 = vld [vmem:[#allocation5 + $0x8] sm:$0xff]  ;;  %v67_v7 = vld [vmem:[#allocation5 + $0x90] sm:$0xff] }
  0x28   :  { %v185_v6 = vand.u32 4294901760, %v49_v2  ;;  %v68_v8 = vld [vmem:[#allocation5 + $0x98] sm:$0xff]  ;;  %v188_v9 = vand.u32 4294901760, %v50_v5  ;;  %v239_v10 = vand.u32 4294901760, %v67_v7  ;;  %v51_v12 = vld [vmem:[#allocation5 + $0x10] sm:$0xff]  ;;  %v69_v18 = vld [vmem:[#allocation5 + $0xa0] sm:$0xff] }
  0x29   :  { %v242_v11 = vand.u32 4294901760, %v68_v8  ;;  %v52_v13 = vld [vmem:[#allocation5 + $0x18] sm:$0xff]  ;;  %v5391_v14 = vpack.c.bf16 %v236_v4, %v233_v3  ;;  %v191_v16 = vand.u32 4294901760, %v51_v12  ;;  %v70_v19 = vld [vmem:[#allocation5 + $0xa8] sm:$0xff]  ;;  %v53_v23 = vld [vmem:[#allocation5 + $0x20] sm:$0xff]  ;;  %v245_v29 = vand.u32 4294901760, %v69_v18 }
  0x2a   :  { %v5393_v15 = vsub.f32 %v49_v2, %v185_v6  ;;  %v194_v17 = vand.u32 4294901760, %v52_v13  ;;  %v5395_v20 = vpack.c.bf16 %v188_v9, %v185_v6  ;;  %v5397_v21 = vsub.f32 %v50_v5, %v188_v9  ;;  %v54_v24 = vld [vmem:[#allocation5 + $0x28] sm:$0xff]  ;;  %v71_v37 = vld [vmem:[#allocation5 + $0xb0] sm:$0xff]  ;;  %v72_v42 = vld [vmem:[#allocation5 + $0xb8] sm:$0xff] }
  0x2b   :  { %v5399_v22 = vpack.c.bf16 %v242_v11, %v239_v10  ;;  %4491 = vmatprep.subr.bf16.mxu0 %v5391_v14  ;;  %v5402_v25 = vsub.f32 %v67_v7, %v239_v10  ;;  %v5404_v26 = vsub.f32 %v68_v8, %v242_v11  ;;  %v5408_v28 = vsub.f32 %v51_v12, %v191_v16  ;;  %v55_v55 = vld [vmem:[#allocation5 + $0x30] sm:$0xff]  ;;  %v56_v56 = vld [vmem:[#allocation5 + $0x38] sm:$0xff]  ;;  %v73_v5 = vld [vmem:[#allocation5 + $0xc0] sm:$0xff] }
  0x2c   :  { %v5406_v27 = vpack.c.bf16 %v194_v17, %v191_v16  ;;  %4493 = vmatpush3.bf16.msra.mxu0 %v5395_v20  ;;  %v248_v30 = vand.u32 4294901760, %v70_v19  ;;  %v5411_v31 = vsub.f32 %v65_v0, %v233_v3  ;;  %v5413_v32 = vsub.f32 %v66_v1, %v236_v4  ;;  %v74_v6 = vld [vmem:[#allocation5 + $0xc8] sm:$0xff]  ;;  %v57_v11 = vld [vmem:[#allocation5 + $0x40] sm:$0xff] }
  0x2d   :  { %4495 = vmatprep.subr.bf16.mxu0 %v5399_v22  ;;  %v197_v33 = vand.u32 4294901760, %v53_v23  ;;  %v200_v34 = vand.u32 4294901760, %v54_v24  ;;  %v7249_v35 = vand.u32 4294901760, %v5393_v15  ;;  %v7248_v36 = vand.u32 4294901760, %v5397_v21 }
  0x2e   :  { %v5418_v38 = vsub.f32 %v52_v13, %v194_v17  ;;  %v5420_v39 = vpack.c.bf16 %v248_v30, %v245_v29  ;;  %v5422_v40 = vsub.f32 %v69_v18, %v245_v29  ;;  %v7253_v41 = vand.u32 4294901760, %v5411_v31  ;;  %v58_v29 = vld [vmem:[#allocation5 + $0x48] sm:$0xff] }
  0x2f   :  { %v5425_v43 = vsub.f32 %v70_v19, %v248_v30  ;;  %v7251_v44 = vand.u32 4294901760, %v5413_v32  ;;  %v5428_v45 = vpack.c.bf16 %v200_v34, %v197_v33  ;;  %v5430_v46 = vsub.f32 %v53_v23, %v197_v33 }
  0x30   :  { %4497 = vmatpush3.bf16.msra.mxu0 %v5406_v27  ;;  %v412_v47 = vsub.f32 %v5411_v31, %v7253_v41  ;;  %v300_v48 = vsub.f32 %v5393_v15, %v7249_v35  ;;  %v307_v49 = vsub.f32 %v5397_v21, %v7248_v36  ;;  %v251_v50 = vand.u32 4294901760, %v71_v37  ;;  %v42_v41 = vld [vmem:[#allocation2 + $0x8] sm:$0xff] }
  0x31   :  { %4499 = vmatprep.subr.bf16.mxu0 %v5420_v39  ;;  %v419_v51 = vsub.f32 %v5413_v32, %v7251_v44  ;;  %v254_v52 = vand.u32 4294901760, %v72_v42  ;;  %v7246_v53 = vand.u32 4294901760, %v5402_v25  ;;  %v7244_v54 = vand.u32 4294901760, %v5404_v26 }
  0x32   :  { %v413_v57 = vand.u32 4294901760, %v412_v47  ;;  %v5448_v58 = vsub.f32 %v54_v24, %v200_v34  ;;  %v301_v59 = vand.u32 4294901760, %v300_v48  ;;  %v308_v60 = vand.u32 4294901760, %v307_v49 }
  0x33   :  { %v420_v61 = vand.u32 4294901760, %v419_v51  ;;  %v5450_v62 = vpack.c.bf16 %v254_v52, %v251_v50  ;;  %v5452_v63 = vsub.f32 %v71_v37, %v251_v50  ;;  %v426_v0 = vsub.f32 %v5402_v25, %v7246_v53 }
  0x34   :  { %4501 = vmatpush3.bf16.msra.mxu0 %v5428_v45  ;;  %v4524_v1 = vpack.c.bf16 %v308_v60, %v301_v59  ;;  %v433_v2 = vsub.f32 %v5404_v26, %v7244_v54  ;;  %v203_v3 = vand.u32 4294901760, %v55_v55  ;;  %v206_v4 = vand.u32 4294901760, %v56_v56  ;;  %v76_v59 = vld [vmem:[#allocation5 + $0xd8] sm:$0xff] }
  0x35   :  { %v4522_v7 = vpack.c.bf16 %v420_v61, %v413_v57  ;;  %4503 = vmatprep.subr.bf16.mxu0 %v5450_v62  ;;  %v427_v8 = vand.u32 4294901760, %v426_v0  ;;  %v7243_v9 = vand.u32 4294901760, %v5408_v28  ;;  %v7241_v10 = vand.u32 4294901760, %v5418_v38  ;;  %v75_v57 = vld [vmem:[#allocation5 + $0xd0] sm:$0xff]  ;;  %v80_v54 = vld [vmem:[#allocation5 + $0xf8] sm:$0xff] }
  0x36   :  { %v5464_v12 = vsub.f32 %v72_v42, %v254_v52  ;;  %v434_v13 = vand.u32 4294901760, %v433_v2  ;;  %v5466_v16 = vpack.c.bf16 %v206_v4, %v203_v3  ;;  %v5468_v17 = vsub.f32 %v55_v55, %v203_v3 }
  0x37   :  { %4523 = vmatprep.subr.bf16.mxu1 %v4522_v7  ;;  %v314_v18 = vsub.f32 %v5408_v28, %v7243_v9  ;;  %v321_v19 = vsub.f32 %v5418_v38, %v7241_v10  ;;  %v257_v23 = vand.u32 4294901760, %v73_v5  ;;  %v260_v24 = vand.u32 4294901760, %v74_v6  ;;  %v79_v9 = vld [vmem:[#allocation5 + $0xf0] sm:$0xff] }
  0x38   :  { %4525 = vmatpush3.bf16.msra.mxu1 %v4524_v1  ;;  %v4526_v30 = vpack.c.bf16 %v434_v13, %v427_v8  ;;  %4505 = vmatpush3.bf16.msra.mxu0 %v5466_v16  ;;  %v7239_v33 = vand.u32 4294901760, %v5422_v40  ;;  %v7238_v34 = vand.u32 4294901760, %v5425_v43  ;;  %v209_v37 = vand.u32 4294901760, %v57_v11  ;;  %v59_v1 = vld [vmem:[#allocation5 + $0x50] sm:$0xff] }
  0x39   :  { %v5479_v42 = vsub.f32 %v56_v56, %v206_v4  ;;  %v315_v47 = vand.u32 4294901760, %v314_v18  ;;  %v322_v48 = vand.u32 4294901760, %v321_v19  ;;  %v5481_v49 = vpack.c.bf16 %v260_v24, %v257_v23  ;;  %v60_v18 = vld [vmem:[#allocation5 + $0x58] sm:$0xff] }
  0x3a   :  { %4527 = vmatprep.subr.bf16.mxu1 %v4526_v30  ;;  %v5483_v50 = vsub.f32 %v73_v5, %v257_v23  ;;  %v440_v51 = vsub.f32 %v5422_v40, %v7239_v33  ;;  %v447_v52 = vsub.f32 %v5425_v43, %v7238_v34  ;;  %v212_v55 = vand.u32 4294901760, %v58_v29 }
  0x3b   :  { %v4528_v56 = vpack.c.bf16 %v322_v48, %v315_v47  ;;  %4507 = vmatprep.subr.bf16.mxu0 %v5481_v49  ;;  %v5492_v60 = vsub.f32 %v74_v6, %v260_v24  ;;  %v7236_v61 = vand.u32 4294901760, %v5430_v46  ;;  %v7234_v0 = vand.u32 4294901760, %v5448_v58 }
  0x3c   :  { %v441_v2 = vand.u32 4294901760, %v440_v51  ;;  %v448_v3 = vand.u32 4294901760, %v447_v52  ;;  %v5496_v4 = vpack.c.bf16 %v212_v55, %v209_v37  ;;  %v5498_v5 = vsub.f32 %v57_v11, %v209_v37 }
  0x3d   :  { %4529 = vmatpush3.bf16.msra.mxu1 %v4528_v56  ;;  %v328_v7 = vsub.f32 %v5430_v46, %v7236_v61  ;;  %v335_v6 = vsub.f32 %v5448_v58, %v7234_v0  ;;  %v263_v8 = vand.u32 4294901760, %v75_v57  ;;  %v266_v13 = vand.u32 4294901760, %v76_v59  ;;  %v78_v0 = vld [vmem:[#allocation5 + $0xe8] sm:$0xff] }
  0x3e   :  { %v4530_v19 = vpack.c.bf16 %v448_v3, %v441_v2  ;;  %4509 = vmatpush3.bf16.msra.mxu0 %v5496_v4  ;;  %v7235_v23 = vand.u32 4294901760, %v5452_v63  ;;  %v7237_v11 = vand.u32 4294901760, %v5464_v12  ;;  %v215_v24 = vand.u32 4294901760, %v59_v1  ;;  %v77_v3 = vld [vmem:[#allocation5 + $0xe0] sm:$0xff] }
  0x3f   :  { %v5509_v30 = vsub.f32 %v58_v29, %v212_v55  ;;  %v329_v37 = vand.u32 4294901760, %v328_v7  ;;  %v336_v47 = vand.u32 4294901760, %v335_v6  ;;  %v5511_v48 = vpack.c.bf16 %v266_v13, %v263_v8  ;;  %v61_v6 = vld [vmem:[#allocation5 + $0x60] sm:$0xff] }
  0x40   :  { %4531 = vmatprep.subr.bf16.mxu1 %v4530_v19  ;;  %v5513_v51 = vsub.f32 %v75_v57, %v263_v8  ;;  %v454_v52 = vsub.f32 %v5452_v63, %v7235_v23  ;;  %v461_v56 = vsub.f32 %v5464_v12, %v7237_v11  ;;  %v218_v2 = vand.u32 4294901760, %v60_v18  ;;  %v62_v11 = vld [vmem:[#allocation5 + $0x68] sm:$0xff] }
  0x41   :  { %v4532_v29 = vpack.c.bf16 %v336_v47, %v329_v37  ;;  %4511 = vmatprep.subr.bf16.mxu0 %v5511_v48  ;;  %v5522_v55 = vsub.f32 %v76_v59, %v266_v13  ;;  %v7240_v7 = vand.u32 4294901760, %v5468_v17  ;;  %v7242_v57 = vand.u32 4294901760, %v5479_v42 }
  0x42   :  { %v455_v8 = vand.u32 4294901760, %v454_v52  ;;  %v462_v19 = vand.u32 4294901760, %v461_v56  ;;  %v5526_v23 = vpack.c.bf16 %v218_v2, %v215_v24  ;;  %v5528_v61 = vsub.f32 %v59_v1, %v215_v24 }
  0x43   :  { %4533 = vmatpush3.bf16.msra.mxu1 %v4532_v29  ;;  %v342_v37 = vsub.f32 %v5468_v17, %v7240_v7  ;;  %v349_v59 = vsub.f32 %v5479_v42, %v7242_v57  ;;  %v269_v13 = vand.u32 4294901760, %v77_v3  ;;  %v272_v47 = vand.u32 4294901760, %v78_v0 }
  0x44   :  { %7427 = vst [vmem:[#allocation11_spill] sm:$0xff] %v5526_v23  ;;  %v4534_v34 = vpack.c.bf16 %v462_v19, %v455_v8  ;;  %4513 = vmatpush3.bf16.msra.mxu0 %v5526_v23  ;;  %v7245_v52 = vand.u32 4294901760, %v5483_v50  ;;  %v7247_v1 = vand.u32 4294901760, %v5492_v60  ;;  %v221_v24 = vand.u32 4294901760, %v61_v6 }
  0x45   :  { %v5539_v56 = vsub.f32 %v60_v18, %v218_v2  ;;  %v343_v29 = vand.u32 4294901760, %v342_v37  ;;  %v350_v33 = vand.u32 4294901760, %v349_v59  ;;  %v5541_v7 = vpack.c.bf16 %v272_v47, %v269_v13  ;;  %v63_v37 = vld [vmem:[#allocation5 + $0x70] sm:$0xff] }
  0x46   :  { %4535 = vmatprep.subr.bf16.mxu1 %v4534_v34  ;;  %v5543_v10 = vsub.f32 %v77_v3, %v269_v13  ;;  %v468_v8 = vsub.f32 %v5483_v50, %v7245_v52  ;;  %v475_v19 = vsub.f32 %v5492_v60, %v7247_v1  ;;  %v224_v57 = vand.u32 4294901760, %v62_v11  ;;  %v64_v1 = vld [vmem:[#allocation5 + $0x78] sm:$0xff] }
  0x47   :  { %7428 = vst [vmem:[#allocation12_spill] sm:$0xff] %v5541_v7  ;;  %v4536_v18 = vpack.c.bf16 %v350_v33, %v343_v29  ;;  %4515 = vmatprep.subr.bf16.mxu0 %v5541_v7  ;;  %v5552_v2 = vsub.f32 %v78_v0, %v272_v47  ;;  %v7250_v34 = vand.u32 4294901760, %v5498_v5  ;;  %v7252_v3 = vand.u32 4294901760, %v5509_v30 }
  0x48   :  { %v469_v59 = vand.u32 4294901760, %v468_v8  ;;  %v476_v13 = vand.u32 4294901760, %v475_v19  ;;  %v5556_v52 = vpack.c.bf16 %v224_v57, %v221_v24  ;;  %v5558_v53 = vsub.f32 %v61_v6, %v221_v24 }
  0x49   :  { %4537 = vmatpush3.bf16.msra.mxu1 %v4536_v18  ;;  %v356_v33 = vsub.f32 %v5498_v5, %v7250_v34  ;;  %v363_v0 = vsub.f32 %v5509_v30, %v7252_v3  ;;  %v275_v47 = vand.u32 4294901760, %v79_v9  ;;  %v278_v29 = vand.u32 4294901760, %v80_v54 }
  0x4a   :  { %7429 = vst [vmem:[#allocation13_spill] sm:$0xff] %v5556_v52  ;;  %v4538_v36 = vpack.c.bf16 %v476_v13, %v469_v59  ;;  %4517 = vmatpush3.bf16.msra.mxu0 %v5556_v52  ;;  %v7256_v8 = vand.u32 4294901760, %v5513_v51  ;;  %v7257_v6 = vand.u32 4294901760, %v5522_v55  ;;  %v227_v24 = vand.u32 4294901760, %v63_v37 }
  0x4b   :  { %v5569_v19 = vsub.f32 %v62_v11, %v224_v57  ;;  %v357_v18 = vand.u32 4294901760, %v356_v33  ;;  %v364_v35 = vand.u32 4294901760, %v363_v0  ;;  %v5571_v34 = vpack.c.bf16 %v278_v29, %v275_v47 }
  0x4c   :  { %4539 = vmatprep.subr.bf16.mxu1 %v4538_v36  ;;  %v5573_v44 = vsub.f32 %v79_v9, %v275_v47  ;;  %v482_v59 = vsub.f32 %v5513_v51, %v7256_v8  ;;  %v489_v13 = vsub.f32 %v5522_v55, %v7257_v6  ;;  %v230_v3 = vand.u32 4294901760, %v64_v1  ;;  %v41_v9 = vld [vmem:[#allocation2] sm:$0xff] }
  0x4d   :  { %7430 = vst [vmem:[#allocation14_spill] sm:$0xff] %v5571_v34  ;;  %v4540_v52 = vpack.c.bf16 %v364_v35, %v357_v18  ;;  %4519 = vmatprep.subr.bf16.mxu0 %v5571_v34  ;;  %v5582_v11 = vsub.f32 %v80_v54, %v278_v29  ;;  %v7258_v57 = vand.u32 4294901760, %v5528_v61  ;;  %v7259_v36 = vand.u32 4294901760, %v5539_v56 }
  0x4e   :  { %v483_v33 = vand.u32 4294901760, %v482_v59  ;;  %v490_v0 = vand.u32 4294901760, %v489_v13  ;;  %v5586_v47 = vpack.c.bf16 %v230_v3, %v227_v24  ;;  %v5588_v8 = vsub.f32 %v63_v37, %v227_v24 }
  0x4f   :  { %4541 = vmatpush3.bf16.msra.mxu1 %v4540_v52  ;;  %v370_v35 = vsub.f32 %v5528_v61, %v7258_v57  ;;  %v377_v54 = vsub.f32 %v5539_v56, %v7259_v36  ;;  %v5596_v29 = vand.u32 4294901760, %v42_v41  ;;  %v7262_v18 = vand.u32 4294901760, %v5543_v10 }
  0x50   :  { %7431 = vst [vmem:[#allocation15_spill] sm:$0xff] %v5586_v47  ;;  %v4542_v6 = vpack.c.bf16 %v490_v0, %v483_v33  ;;  %4521 = vmatpush3.bf16.msra.mxu0 %v5586_v47  ;;  %v7268_v59 = vand.u32 4294901760, %v5552_v2  ;;  %v4554_v52 = vpack.c.bf16 %v5413_v32, %v5411_v31  ;;  %v5603_v37 = vand.u32 4294901760, %v41_v9 }
  0x51   :  { %7432 = vst [vmem:[#allocation16_spill] sm:$0xff] %v5596_v29  ;;  %v371_v24 = vand.u32 4294901760, %v370_v35  ;;  %v378_v13 = vand.u32 4294901760, %v377_v54  ;;  %v5606_v57 = vsub.f32 %v42_v41, %v5596_v29  ;;  %v496_v36 = vsub.f32 %v5543_v10, %v7262_v18  ;;  %521 = vmatprep.mubr.f32.mxu1 %v5596_v29 }
  0x52   :  { %4543 = vmatprep.subr.bf16.mxu1 %v4542_v6  ;;  %v503_v33 = vsub.f32 %v5552_v2, %v7268_v59  ;;  %4555 = vmatprep.subr.bf16.mxu0 %v4554_v52  ;;  %v5616_v0 = vsub.f32 %v41_v9, %v5603_v37  ;;  %v7267_v35 = vand.u32 4294901760, %v5558_v53  ;;  %v7269_v41 = vand.u32 4294901760, %v5569_v19 }
  0x53   :  { %v5620_v54 = vsub.f32 %v64_v1, %v230_v3  ;;  %v4544_v47 = vpack.c.bf16 %v378_v13, %v371_v24  ;;  %v7270_v18 = vand.u32 4294901760, %v5606_v57  ;;  %v497_v34 = vand.u32 4294901760, %v496_v36 }
  0x54   :  { %v504_v29 = vand.u32 4294901760, %v503_v33  ;;  %v288_v6 = vand.u32 4294901760, %v5616_v0  ;;  %v384_v52 = vsub.f32 %v5558_v53, %v7267_v35  ;;  %v391_v9 = vsub.f32 %v5569_v19, %v7269_v41 }
  0x55   :  { %4545 = vmatpush3.bf16.msra.mxu1 %v4544_v47  ;;  %v283_v1 = vsub.f32 %v5606_v57, %v7270_v18  ;;  %v4556_v3 = vpack.c.bf16 %v5397_v21, %v5393_v15  ;;  %v7275_v36 = vand.u32 4294901760, %v5573_v44  ;;  %v7278_v24 = vand.u32 4294901760, %v5582_v11 }
  0x56   :  { %v4546_v13 = vpack.c.bf16 %v504_v29, %v497_v34  ;;  %v289_v33 = vsub.f32 %v5616_v0, %v288_v6  ;;  %v385_v35 = vand.u32 4294901760, %v384_v52  ;;  %v392_v59 = vand.u32 4294901760, %v391_v9 }
  0x57   :  { %v284_v41 = vand.u32 4294901760, %v283_v1  ;;  %v510_v47 = vsub.f32 %v5573_v44, %v7275_v36  ;;  %v517_v18 = vsub.f32 %v5582_v11, %v7278_v24  ;;  %v7277_v7 = vand.u32 4294901760, %v5588_v8 }
  0x58   :  { %4547 = vmatprep.subr.bf16.mxu1 %v4546_v13  ;;  %v290_v23 = vand.u32 4294901760, %v289_v33  ;;  %v4548_v34 = vpack.c.bf16 %v392_v59, %v385_v35  ;;  %v4558_v29 = vpack.c.bf16 %v5404_v26, %v5402_v25  ;;  %v7276_v52 = vand.u32 4294901760, %v5620_v54 }
  0x59   :  { %285 = vmatprep.mubr.f32.mxu0 %v284_v41  ;;  %v511_v9 = vand.u32 4294901760, %v510_v47  ;;  %v518_v1 = vand.u32 4294901760, %v517_v18  ;;  %v398_v36 = vsub.f32 %v5588_v8, %v7277_v7  ;;  %v4560_v33 = vpack.c.bf16 %v5418_v38, %v5408_v28 }
  0x5a   :  { %291 = vmatmul.mubr.f32.vlgmr.msra.gmra.mrb[0].mxu0 %v290_v23  ;;  %4549 = vmatpush3.bf16.msra.mxu1 %v4548_v34  ;;  %v405_v13 = vsub.f32 %v5620_v54, %v7276_v52  ;;  %v4562_v41 = vpack.c.bf16 %v5425_v43, %v5422_v40  ;;  %v4564_v23 = vpack.c.bf16 %v5448_v58, %v5430_v46  ;;  %v7434_v34 = vand.u32 4294901760, %v5413_v32 }
  0x5b   :  { %4557 = vmatpush3.bf16.msra.mxu0 %v4556_v3  ;;  %v4550_v59 = vpack.c.bf16 %v518_v1, %v511_v9  ;;  %v399_v35 = vand.u32 4294901760, %v398_v36  ;;  %658 = vmatprep.mubr.f32.mxu0 %v5606_v57  ;;  %v4566_v47 = vpack.c.bf16 %v5464_v12, %v5452_v63  ;;  %v7433_v36 = vand.u32 4294901760, %v5411_v31 }
  0x5c   :  { %4559 = vmatprep.subr.bf16.mxu0 %v4558_v29  ;;  %v406_v18 = vand.u32 4294901760, %v405_v13  ;;  %v7435_v1 = vand.u32 4294901760, %v5393_v15  ;;  %v7436_v29 = vand.u32 4294901760, %v5397_v21  ;;  %v7437_v52 = vand.u32 4294901760, %v5402_v25 }
  0x5d   :  { %4551 = vmatprep.subr.bf16.mxu1 %v4550_v59  ;;  %v4618_v9 = vpack.c.bf16 %v7434_v34, %v7433_v36  ;;  %v7438_v59 = vand.u32 4294901760, %v5404_v26  ;;  %v7439_v24 = vand.u32 4294901760, %v5408_v28  ;;  %v7441_v31 = vand.u32 4294901760, %v5422_v40 }
  0x5e   :  { %v4552_v3 = vpack.c.bf16 %v406_v18, %v399_v35  ;;  %v4620_v13 = vpack.c.bf16 %v7436_v29, %v7435_v1  ;;  %v7440_v35 = vand.u32 4294901760, %v5418_v38  ;;  %v7442_v32 = vand.u32 4294901760, %v5425_v43  ;;  %v7456_v29 = vld [vmem:[#allocation16_spill] sm:$0xff] }
  0x5f   :  { %v4622_v7 = vpack.c.bf16 %v7438_v59, %v7437_v52  ;;  %4561 = vmatpush3.bf16.msra.mxu0 %v4560_v33  ;;  %v7443_v15 = vand.u32 4294901760, %v5430_v46  ;;  %v7444_v21 = vand.u32 4294901760, %v5448_v58  ;;  %v7445_v25 = vand.u32 4294901760, %v5452_v63  ;;  %v98_v59 = vld [vmem:[#allocation5 + $0x188] sm:$0xff] }
  0x60   :  { %v4624_v18 = vpack.c.bf16 %v7440_v35, %v7439_v24  ;;  %v4626_v36 = vpack.c.bf16 %v7442_v32, %v7441_v31  ;;  %v7446_v26 = vand.u32 4294901760, %v5464_v12  ;;  %4553 = vmatpush3.bf16.msra.mxu1 %v4552_v3  ;;  %4563 = vmatprep.subr.bf16.mxu0 %v4562_v41  ;;  %v7447_v28 = vand.u32 4294901760, %v5468_v17  ;;  %v81_v35 = vld [vmem:[#allocation5 + $0x100] sm:$0xff]  ;;  %v82_v31 = vld [vmem:[#allocation5 + $0x108] sm:$0xff]  ;;  %v7457_v32 = vld [vmem:[#allocation13_spill] sm:$0xff] }
  0x61   :  { %v5689_v34 = vpack.c.bf16 %v7444_v21, %v7443_v15  ;;  %v7448_v38 = vand.u32 4294901760, %v5479_v42  ;;  %v7449_v43 = vand.u32 4294901760, %v5483_v50  ;;  %v7450_v46 = vand.u32 4294901760, %v5492_v60  ;;  %4587 = vmatprep.subr.bf16.mxu1 %v5391_v14  ;;  %v7458_v15 = vld [vmem:[#allocation14_spill] sm:$0xff] }
  0x62   :  { %v5695_v52 = vpack.c.bf16 %v7446_v26, %v7445_v25  ;;  %v7451_v63 = vand.u32 4294901760, %v5498_v5  ;;  %v7452_v12 = vand.u32 4294901760, %v5509_v30  ;;  %v4568_v33 = vpack.c.bf16 %v5479_v42, %v5468_v17 }
  0x63   :  { %v5701_v40 = vpack.c.bf16 %v7448_v38, %v7447_v28  ;;  %v5707_v58 = vpack.c.bf16 %v7450_v46, %v7449_v43  ;;  %523 = vmatmul.mubr.f32.vlgmr.msra.gmra.mrb[0].mxu1 %v5603_v37  ;;  %4565 = vmatpush3.bf16.msra.mxu0 %v4564_v23  ;;  %v4570_v41 = vpack.c.bf16 %v5492_v60, %v5483_v50  ;;  %v7453_v3 = vand.u32 4294901760, %v5606_v57  ;;  %v7454_v57 = vld [vmem:[#allocation11_spill] sm:$0xff]  ;;  %v7455_v23 = vld [vmem:[#allocation12_spill] sm:$0xff] }
  0x64   :  { %v5713_v24 = vpack.c.bf16 %v7452_v12, %v7451_v63  ;;  %4589 = vmatpush3.bf16.msra.mxu1 %v5395_v20  ;;  %4567 = vmatprep.subr.bf16.mxu0 %v4566_v47  ;;  %v4572_v1 = vpack.c.bf16 %v5509_v30, %v5498_v5  ;;  %v4574_v17 = vpack.c.bf16 %v5522_v55, %v5513_v51  ;;  %v97_v47 = vld [vmem:[#allocation5 + $0x180] sm:$0xff]  ;;  %v1098_v25 = vand.u32 4294901760, %v98_v59  ;;  %v7459_v28 = vld [vmem:[#allocation15_spill] sm:$0xff]  ;;  %v99_v38 = vld [vmem:[#allocation5 + $0x190] sm:$0xff] }
  0x65   :  { %4591 = vmatprep.subr.bf16.mxu1 %v5399_v22  ;;  %765 = vmatprep.mubr.f32.mxu1 %v7453_v3  ;;  %v4576_v42 = vpack.c.bf16 %v5539_v56, %v5528_v61  ;;  %v4578_v50 = vpack.c.bf16 %v5552_v2, %v5543_v10  ;;  %v4580_v60 = vpack.c.bf16 %v5569_v19, %v5558_v53  ;;  %v1095_v21 = vand.u32 4294901760, %v97_v47  ;;  %v83_v46 = vld [vmem:[#allocation5 + $0x110] sm:$0xff]  ;;  %v84_v63 = vld [vmem:[#allocation5 + $0x118] sm:$0xff] }
  0x66   :  { %v4582_v5 = vpack.c.bf16 %v5582_v11, %v5573_v44  ;;  %v4584_v30 = vpack.c.bf16 %v5620_v54, %v5588_v8  ;;  %v1047_v26 = vand.u32 4294901760, %v81_v35  ;;  %v5757_v12 = vsub.f32 %v98_v59, %v1098_v25 }
  0x67   :  { %4569 = vmatpush3.bf16.msra.mxu0 %v4568_v33  ;;  %v5755_v43 = vsub.f32 %v97_v47, %v1095_v21 }
  0x68   :  { %4593 = vmatpush3.bf16.msra.mxu1 %v5406_v27  ;;  %4571 = vmatprep.subr.bf16.mxu0 %v4570_v41  ;;  %v1101_v41 = vand.u32 4294901760, %v99_v38  ;;  %v7288_v59 = vand.u32 4294901760, %v5757_v12 }
  0x69   :  { %4595 = vmatprep.subr.bf16.mxu1 %v5420_v39 }
  0x6b   :  { %4573 = vmatpush3.bf16.msra.mxu0 %v4572_v1  ;;  %v7462_v1 = vand.u32 4294901760, %v5528_v61 }
  0x6c   :  { %4597 = vmatpush3.bf16.msra.mxu1 %v5428_v45  ;;  %4575 = vmatprep.subr.bf16.mxu0 %v4574_v17  ;;  %v7463_v17 = vand.u32 4294901760, %v5539_v56  ;;  %v7468_v56 = vand.u32 4294901760, %v5573_v44  ;;  %v85_v44 = vld [vmem:[#allocation5 + $0x120] sm:$0xff] }
  0x6d   :  { %4599 = vmatprep.subr.bf16.mxu1 %v5450_v62 }
  0x6f   :  { %4577 = vmatpush3.bf16.msra.mxu0 %v4576_v42  ;;  %v4640_v42 = vpack.c.bf16 %v7463_v17, %v7462_v1  ;;  %v103_v17 = vld [vmem:[#allocation5 + $0x1b0] sm:$0xff] }
  0x70   :  { %4601 = vmatpush3.bf16.msra.mxu1 %v5466_v16  ;;  %4579 = vmatprep.subr.bf16.mxu0 %v4578_v50  ;;  %v101_v50 = vld [vmem:[#allocation5 + $0x1a0] sm:$0xff] }
  0x71   :  { %4603 = vmatprep.subr.bf16.mxu1 %v5481_v49 }
  0x73   :  { %4581 = vmatpush3.bf16.msra.mxu0 %v4580_v60  ;;  %v102_v60 = vld [vmem:[#allocation5 + $0x1a8] sm:$0xff] }
  0x74   :  { %4605 = vmatpush3.bf16.msra.mxu1 %v5496_v4  ;;  %4583 = vmatprep.subr.bf16.mxu0 %v4582_v5 }
  0x75   :  { %4607 = vmatprep.subr.bf16.mxu1 %v5511_v48 }
  0x77   :  { %4585 = vmatpush3.bf16.msra.mxu0 %v4584_v30  ;;  %v7471_v30 = vand.u32 4294901760, %v5620_v54 }
  0x78   :  { %4609 = vmatpush3.bf16.msra.mxu1 %v7454_v57  ;;  %4619 = vmatprep.subr.bf16.mxu0 %v4618_v9  ;;  %v1050_v9 = vand.u32 4294901760, %v82_v31 }
  0x79   :  { %4611 = vmatprep.subr.bf16.mxu1 %v7455_v23 }
  0x7a   :  { %661 = vmatmul.mubr.f32.vlgmr.msra.gmra.mrb[2].mxu0 %v5616_v0  ;;  %v5761_v33 = vsub.f32 %v82_v31, %v1050_v9  ;;  %v7464_v0 = vand.u32 4294901760, %v5543_v10  ;;  %v7469_v10 = vand.u32 4294901760, %v5582_v11 }
  0x7b   :  { %4621 = vmatpush3.bf16.msra.mxu0 %v4620_v13  ;;  %935 = vmatprep.mubr.f32.mxu0 %v7456_v29  ;;  %v100_v13 = vld [vmem:[#allocation5 + $0x198] sm:$0xff] }
  0x7c   :  { %4613 = vmatpush3.bf16.msra.mxu1 %v7457_v32  ;;  %4623 = vmatprep.subr.bf16.mxu0 %v4622_v7  ;;  %v5759_v7 = vsub.f32 %v81_v35, %v1047_v26  ;;  %v1104_v3 = vand.u32 4294901760, %v100_v13  ;;  %v5793_v5 = vpack.c.bf16 %v7469_v10, %v7468_v56  ;;  %v86_v35 = vld [vmem:[#allocation5 + $0x128] sm:$0xff]  ;;  %v7279_v31 = vand.u32 4294901760, %v5761_v33 }
  0x7d   :  { %4615 = vmatprep.subr.bf16.mxu1 %v7458_v15 }
  0x7e   :  { %v7285_v11 = vand.u32 4294901760, %v5759_v7  ;;  %v5811_v54 = vpack.c.bf16 %v1104_v3, %v1101_v41 }
  0x7f   :  { %4625 = vmatpush3.bf16.msra.mxu0 %v4624_v18  ;;  %v7460_v18 = vand.u32 4294901760, %v5513_v51  ;;  %v1053_v51 = vand.u32 4294901760, %v83_v46 }
  0x80   :  { %4617 = vmatpush3.bf16.msra.mxu1 %v7459_v28  ;;  %4627 = vmatprep.subr.bf16.mxu0 %v4626_v36  ;;  %v7461_v36 = vand.u32 4294901760, %v5522_v55  ;;  %v1056_v55 = vand.u32 4294901760, %v84_v63  ;;  %7473 = vst [vmem:[#allocation12_spill] sm:$0xff] %v5811_v54 }
  0x81   :  { %4651 = vmatprep.subr.bf16.mxu1 %v5391_v14 }
  0x82   :  { %v4638_v14 = vpack.c.bf16 %v7461_v36, %v7460_v18  ;;  %v1110_v18 = vand.u32 4294901760, %v102_v60  ;;  %v5819_v36 = vpack.c.bf16 %v1056_v55, %v1053_v51 }
  0x83   :  { %769 = vmatmul.mubr.f32.vlgmr.msra.gmra.mrb[2].mxu1 %v288_v6  ;;  %4629 = vmatpush3.bf16.msra.mxu0 %v5689_v34  ;;  %v7465_v6 = vand.u32 4294901760, %v5552_v2  ;;  %v7470_v2 = vand.u32 4294901760, %v5588_v8  ;;  %v5809_v8 = vpack.c.bf16 %v1050_v9, %v1047_v26  ;;  %v1059_v9 = vand.u32 4294901760, %v85_v44 }
  0x84   :  { %4653 = vmatpush3.bf16.msra.mxu1 %v5395_v20  ;;  %4631 = vmatprep.subr.bf16.mxu0 %v5695_v52  ;;  %v7466_v20 = vand.u32 4294901760, %v5558_v53  ;;  %v7467_v52 = vand.u32 4294901760, %v5569_v19  ;;  %v44_v53 = vld [vmem:[#allocation2 + $0x18] sm:$0xff]  ;;  %v5803_v19 = vpack.c.bf16 %v1098_v25, %v1095_v21  ;;  %v5815_v21 = vsub.f32 %v99_v38, %v1101_v41  ;;  %7474 = vst [vmem:[#allocation16_spill] sm:$0xff] %v5819_v36 }
  0x85   :  { %v5780_v34 = vpack.c.bf16 %v7465_v6, %v7464_v0  ;;  %4655 = vmatprep.subr.bf16.mxu1 %v5399_v22  ;;  %v5799_v47 = vpack.c.bf16 %v7471_v30, %v7470_v2  ;;  %1039 = vmatprep.mubr.f32.mxu1 %v7456_v29  ;;  %v7289_v22 = vand.u32 4294901760, %v5755_v43  ;;  %7472 = vst [vmem:[#allocation11_spill] sm:$0xff] %v5809_v8  ;;  %v1107_v29 = vand.u32 4294901760, %v101_v50 }
  0x86   :  { %v5787_v61 = vpack.c.bf16 %v7467_v52, %v7466_v20  ;;  %v5817_v25 = vsub.f32 %v100_v13, %v1104_v3  ;;  %v5821_v1 = vand.u32 4294901760, %v44_v53  ;;  %v5829_v38 = vsub.f32 %v84_v63, %v1056_v55  ;;  %v87_v52 = vld [vmem:[#allocation5 + $0x130] sm:$0xff] }
  0x87   :  { %4633 = vmatpush3.bf16.msra.mxu0 %v5701_v40  ;;  %v5824_v40 = vsub.f32 %v83_v46, %v1053_v51  ;;  %v1274_v26 = vsub.f32 %v5755_v43, %v7289_v22  ;;  %v1281_v13 = vsub.f32 %v5757_v12, %v7288_v59  ;;  %v1169_v46 = vsub.f32 %v5761_v33, %v7279_v31  ;;  %v105_v31 = vld [vmem:[#allocation5 + $0x1c0] sm:$0xff]  ;;  %v92_v22 = vld [vmem:[#allocation5 + $0x158] sm:$0xff] }
  0x88   :  { %4657 = vmatpush3.bf16.msra.mxu1 %v5406_v27  ;;  %4635 = vmatprep.subr.bf16.mxu0 %v5707_v58  ;;  %7475 = vst [vmem:[#allocation13_spill] sm:$0xff] %v5821_v1  ;;  %v1062_v27 = vand.u32 4294901760, %v86_v35  ;;  %v104_v58 = vld [vmem:[#allocation5 + $0x1b8] sm:$0xff]  ;;  %v5841_v41 = vpack.c.bf16 %v1110_v18, %v1107_v29  ;;  %v5843_v3 = vsub.f32 %v101_v50, %v1107_v29  ;;  %v1113_v6 = vand.u32 4294901760, %v103_v17 }
  0x89   :  { %4659 = vmatprep.subr.bf16.mxu1 %v5420_v39  ;;  %v1162_v39 = vsub.f32 %v5759_v7, %v7285_v11  ;;  %v5845_v63 = vsub.f32 %v102_v60, %v1110_v18  ;;  %v5848_v0 = vsub.f32 %v44_v53, %v5821_v1  ;;  %v1116_v51 = vand.u32 4294901760, %v104_v58 }
  0x8a   :  { %7476 = vst [vmem:[#allocation14_spill] sm:$0xff] %v5841_v41  ;;  %v7283_v55 = vand.u32 4294901760, %v5815_v21  ;;  %v7280_v20 = vand.u32 4294901760, %v5817_v25  ;;  %v1275_v50 = vand.u32 4294901760, %v1274_v26  ;;  %v5854_v56 = vpack.c.bf16 %v1062_v27, %v1059_v9 }
  0x8b   :  { %4637 = vmatpush3.bf16.msra.mxu0 %v5713_v24  ;;  %v88_v24 = vld [vmem:[#allocation5 + $0x138] sm:$0xff]  ;;  %v5856_v60 = vsub.f32 %v85_v44, %v1059_v9  ;;  %v5858_v10 = vsub.f32 %v86_v35, %v1062_v27  ;;  %v1282_v2 = vand.u32 4294901760, %v1281_v13  ;;  %v7282_v30 = vand.u32 4294901760, %v5824_v40  ;;  %v106_v27 = vld [vmem:[#allocation5 + $0x1c8] sm:$0xff] }
  0x8c   :  { %4661 = vmatpush3.bf16.msra.mxu1 %v5428_v45  ;;  %4639 = vmatprep.subr.bf16.mxu0 %v4638_v14  ;;  %7477 = vst [vmem:[#allocation15_spill] sm:$0xff] %v5854_v56  ;;  %v1163_v45 = vand.u32 4294901760, %v1162_v39  ;;  %v1170_v14 = vand.u32 4294901760, %v1169_v46  ;;  %v1065_v53 = vand.u32 4294901760, %v87_v52  ;;  %v1068_v29 = vand.u32 4294901760, %v88_v24 }
  0x8d   :  { %4663 = vmatprep.subr.bf16.mxu1 %v5450_v62  ;;  %v7281_v18 = vand.u32 4294901760, %v5829_v38  ;;  %v7292_v62 = vand.u32 4294901760, %v5848_v0  ;;  %v5865_v44 = vpack.c.bf16 %v1116_v51, %v1113_v6  ;;  %v1288_v35 = vsub.f32 %v5815_v21, %v7283_v55 }
  0x8e   :  { %v5874_v26 = vsub.f32 %v103_v17, %v1113_v6  ;;  %v5876_v9 = vsub.f32 %v104_v58, %v1116_v51  ;;  %v5880_v13 = vpack.c.bf16 %v1282_v2, %v1275_v50  ;;  %v5882_v39 = vpack.c.bf16 %v1170_v14, %v1163_v45 }
  0x8f   :  { %4641 = vmatpush3.bf16.msra.mxu0 %v4640_v42  ;;  %7478 = vst [vmem:[#allocation17_spill] sm:$0xff] %v5865_v44  ;;  %v1295_v42 = vsub.f32 %v5817_v25, %v7280_v20  ;;  %v1176_v46 = vsub.f32 %v5824_v40, %v7282_v30  ;;  %v1119_v20 = vand.u32 4294901760, %v105_v31  ;;  %v1183_v17 = vsub.f32 %v5829_v38, %v7281_v18 }
  0x90   :  { %4665 = vmatpush3.bf16.msra.mxu1 %v5466_v16  ;;  %4643 = vmatprep.subr.bf16.mxu0 %v5780_v34  ;;  %v7284_v16 = vand.u32 4294901760, %v5843_v3  ;;  %v7287_v34 = vand.u32 4294901760, %v5845_v63  ;;  %v7286_v58 = vand.u32 4294901760, %v5856_v60  ;;  %v1145_v6 = vsub.f32 %v5848_v0, %v7292_v62 }
  0x91   :  { %4667 = vmatprep.subr.bf16.mxu1 %v5481_v49  ;;  %v5888_v49 = vpack.c.bf16 %v1068_v29, %v1065_v53  ;;  %v1289_v51 = vand.u32 4294901760, %v1288_v35  ;;  %v1296_v50 = vand.u32 4294901760, %v1295_v42  ;;  %v1122_v2 = vand.u32 4294901760, %v106_v27  ;;  %v90_v42 = vld [vmem:[#allocation5 + $0x148] sm:$0xff] }
  0x92   :  { %v7291_v45 = vand.u32 4294901760, %v5858_v10  ;;  %v5901_v14 = vsub.f32 %v87_v52, %v1065_v53  ;;  %v5903_v18 = vsub.f32 %v88_v24, %v1068_v29  ;;  %v1302_v30 = vsub.f32 %v5843_v3, %v7284_v16  ;;  %v107_v29 = vld [vmem:[#allocation5 + $0x1d0] sm:$0xff]  ;;  %v108_v16 = vld [vmem:[#allocation5 + $0x1d8] sm:$0xff] }
  0x93   :  { %4645 = vmatpush3.bf16.msra.mxu0 %v5787_v61  ;;  %7479 = vst [vmem:[#allocation18_spill] sm:$0xff] %v5888_v49  ;;  %v89_v61 = vld [vmem:[#allocation5 + $0x140] sm:$0xff]  ;;  %v5911_v35 = vsub.f32 %v105_v31, %v1119_v20  ;;  %v7290_v55 = vand.u32 4294901760, %v5874_v26  ;;  %v1184_v52 = vand.u32 4294901760, %v1183_v17  ;;  %v1190_v53 = vsub.f32 %v5856_v60, %v7286_v58 }
  0x94   :  { %4669 = vmatpush3.bf16.msra.mxu1 %v5496_v4  ;;  %4647 = vmatprep.subr.bf16.mxu0 %v5793_v5  ;;  %v1309_v4 = vsub.f32 %v5845_v63, %v7287_v34  ;;  %v1177_v5 = vand.u32 4294901760, %v1176_v46  ;;  %v1071_v24 = vand.u32 4294901760, %v89_v61  ;;  %v1146_v11 = vand.u32 4294901760, %v1145_v6  ;;  %v91_v6 = vld [vmem:[#allocation5 + $0x150] sm:$0xff] }
  0x95   :  { %4671 = vmatprep.subr.bf16.mxu1 %v5511_v48  ;;  %v7293_v48 = vand.u32 4294901760, %v5876_v9  ;;  %v5921_v31 = vpack.c.bf16 %v1296_v50, %v1289_v51  ;;  %v5923_v46 = vpack.c.bf16 %v1122_v2, %v1119_v20  ;;  %v5929_v17 = vsub.f32 %v106_v27, %v1122_v2 }
  0x96   :  { %v1303_v58 = vand.u32 4294901760, %v1302_v30  ;;  %v1310_v34 = vand.u32 4294901760, %v1309_v4  ;;  %v1074_v59 = vand.u32 4294901760, %v90_v42  ;;  %v1128_v51 = vand.u32 4294901760, %v108_v16 }
  0x97   :  { %4649 = vmatpush3.bf16.msra.mxu0 %v5799_v47  ;;  %7480 = vst [vmem:[#allocation19_spill] sm:$0xff] %v5923_v46  ;;  %v1197_v47 = vsub.f32 %v5858_v10, %v7291_v45  ;;  %v1316_v20 = vsub.f32 %v5874_v26, %v7290_v55  ;;  %v1323_v50 = vsub.f32 %v5876_v9, %v7293_v48  ;;  %v1191_v27 = vand.u32 4294901760, %v1190_v53  ;;  %v109_v48 = vld [vmem:[#allocation5 + $0x1e0] sm:$0xff]  ;;  %v110_v53 = vld [vmem:[#allocation5 + $0x1e8] sm:$0xff] }
  0x98   :  { %4673 = vmatpush3.bf16.msra.mxu1 %v7454_v57  ;;  %4683 = vmatprep.subr.bf16.mxu0 %v5803_v19  ;;  %v1125_v57 = vand.u32 4294901760, %v107_v29  ;;  %v5941_v30 = vsub.f32 %v89_v61, %v1071_v24  ;;  %v1077_v55 = vand.u32 4294901760, %v91_v6  ;;  %v1080_v45 = vand.u32 4294901760, %v92_v22 }
  0x99   :  { %4675 = vmatprep.subr.bf16.mxu1 %v7455_v23  ;;  %v5939_v23 = vpack.c.bf16 %v1184_v52, %v1177_v5  ;;  %v1198_v4 = vand.u32 4294901760, %v1197_v47  ;;  %v7298_v62 = vand.u32 4294901760, %v5903_v18  ;;  %v5948_v5 = vpack.c.bf16 %v1310_v34, %v1303_v58 }
  0x9a   :  { %937 = vmatmul.mubr.f32.vlgmr.msra.gmra.mrb[4].mxu0 %v5603_v37  ;;  %v5950_v61 = vpack.c.bf16 %v1074_v59, %v1071_v24  ;;  %v5952_v52 = vsub.f32 %v90_v42, %v1074_v59  ;;  %v1317_v2 = vand.u32 4294901760, %v1316_v20  ;;  %v1324_v47 = vand.u32 4294901760, %v1323_v50  ;;  %v5985_v50 = vld [vmem:[#allocation5 + $0x168] sm:$0xff] }
  0x9b   :  { %4685 = vmatpush3.bf16.msra.mxu0 %v5809_v8  ;;  %1147 = vmatprep.mubr.f32.mxu0 %v1146_v11  ;;  %v7300_v11 = vand.u32 4294901760, %v5911_v35  ;;  %v5958_v8 = vld [vmem:[#allocation5 + $0x160] sm:$0xff]  ;;  %v5963_v34 = vsub.f32 %v108_v16, %v1128_v51  ;;  %v7484_v59 = vand.u32 4294901760, %v5901_v14  ;;  %v1131_v42 = vand.u32 4294901760, %v109_v48 }
  0x9c   :  { %4677 = vmatpush3.bf16.msra.mxu1 %v7457_v32  ;;  %4687 = vmatprep.subr.bf16.mxu0 %v5811_v54  ;;  %v5955_v32 = vpack.c.bf16 %v1128_v51, %v1125_v57  ;;  %v7299_v54 = vand.u32 4294901760, %v5929_v17  ;;  %v5970_v24 = vpack.c.bf16 %v1198_v4, %v1191_v27  ;;  %v5972_v20 = vpack.c.bf16 %v1080_v45, %v1077_v55 }
  0x9d   :  { %4679 = vmatprep.subr.bf16.mxu1 %v7458_v15  ;;  %v5961_v15 = vsub.f32 %v107_v29, %v1125_v57  ;;  %7483 = vst [vmem:[#allocation22_spill] sm:$0xff] %v5963_v34  ;;  %v1204_v58 = vsub.f32 %v5901_v14, %v7484_v59  ;;  %v1211_v29 = vsub.f32 %v5903_v18, %v7298_v62  ;;  %v1134_v57 = vand.u32 4294901760, %v110_v53 }
  0x9e   :  { %7481 = vst [vmem:[#allocation20_spill] sm:$0xff] %v5955_v32  ;;  %v5978_v16 = vsub.f32 %v91_v6, %v1077_v55  ;;  %v5980_v51 = vsub.f32 %v92_v22, %v1080_v45  ;;  %v7301_v27 = vand.u32 4294901760, %v5958_v8  ;;  %v4726_v4 = vpack.c.bf16 %v1324_v47, %v1317_v2  ;;  %v5995_v22 = vld [vmem:[#allocation5 + $0x1f8] sm:$0xff]  ;;  %v6018_v2 = vld [vmem:[#allocation5 + $0x170] sm:$0xff] }
  0x9f   :  { %4689 = vmatpush3.bf16.msra.mxu0 %v5819_v36  ;;  %7482 = vst [vmem:[#allocation21_spill] sm:$0xff] %v5961_v15  ;;  %v1337_v59 = vsub.f32 %v5929_v17, %v7299_v54  ;;  %v1205_v45 = vand.u32 4294901760, %v1204_v58  ;;  %v5999_v6 = vsub.f32 %v109_v48, %v1131_v42  ;;  %v43_v54 = vld [vmem:[#allocation2 + $0x10] sm:$0xff]  ;;  %v6005_v55 = vpack.c.bf16 %v1134_v57, %v1131_v42  ;;  %v6020_v42 = vld [vmem:[#allocation5 + $0x178] sm:$0xff] }
  0xa0   :  { %4681 = vmatpush3.bf16.msra.mxu1 %v7459_v28  ;;  %4691 = vmatprep.subr.bf16.mxu0 %v5841_v41  ;;  %v1330_v28 = vsub.f32 %v5911_v35, %v7300_v11  ;;  %v1212_v11 = vand.u32 4294901760, %v1211_v29  ;;  %v6007_v62 = vsub.f32 %v110_v53, %v1134_v57  ;;  %v6014_v58 = vsub.f32 %v5958_v8, %v7301_v27 }
  0xa1   :  { %4715 = vmatprep.subr.bf16.mxu1 %v5880_v13  ;;  %v5993_v13 = vld [vmem:[#allocation5 + $0x1f0] sm:$0xff]  ;;  %v1338_v53 = vand.u32 4294901760, %v1337_v59  ;;  %v7485_v29 = vand.u32 4294901760, %v5941_v30  ;;  %v7486_v57 = vand.u32 4294901760, %v5952_v52  ;;  %v6029_v27 = vand.u32 4294901760, %v43_v54 }
  0xa2   :  { %v1331_v48 = vand.u32 4294901760, %v1330_v28  ;;  %v1137_v47 = vand.u32 4294901760, %v5993_v13  ;;  %v7488_v41 = vand.u32 4294901760, %v5963_v34 }
  0xa3   :  { %1041 = vmatmul.mubr.f32.vlgmr.msra.gmra.mrb[4].mxu1 %v5603_v37  ;;  %4693 = vmatpush3.bf16.msra.mxu0 %v5854_v56  ;;  %v1086_v37 = vand.u32 4294901760, %v5985_v50  ;;  %v1225_v28 = vsub.f32 %v5952_v52, %v7486_v57  ;;  %v4728_v57 = vpack.c.bf16 %v1212_v11, %v1205_v45 }
  0xa4   :  { %4717 = vmatpush3.bf16.msra.mxu1 %v5882_v39  ;;  %4695 = vmatprep.subr.bf16.mxu0 %v5865_v44  ;;  %v1140_v39 = vand.u32 4294901760, %v5995_v22  ;;  %v7487_v44 = vand.u32 4294901760, %v5961_v15  ;;  %v1351_v59 = vsub.f32 %v5963_v34, %v7488_v41  ;;  %v6049_v41 = vsub.f32 %v5993_v13, %v1137_v47 }
  0xa5   :  { %4719 = vmatprep.subr.bf16.mxu1 %v5921_v31  ;;  %1383 = vmatprep.mubr.f32.mxu1 %v5821_v1  ;;  %v1218_v31 = vsub.f32 %v5941_v30, %v7485_v29  ;;  %v6043_v36 = vsub.f32 %v5985_v50, %v1086_v37  ;;  %v7322_v29 = vand.u32 4294901760, %v6007_v62  ;;  %v4730_v11 = vpack.c.bf16 %v1338_v53, %v1331_v48 }
  0xa6   :  { %v1344_v56 = vsub.f32 %v5961_v15, %v7487_v44  ;;  %v1092_v44 = vand.u32 4294901760, %v6020_v42  ;;  %v6052_v1 = vsub.f32 %v5995_v22, %v1140_v39  ;;  %v1226_v50 = vand.u32 4294901760, %v1225_v28 }
  0xa7   :  { %4697 = vmatpush3.bf16.msra.mxu0 %v5888_v49  ;;  %v1089_v49 = vand.u32 4294901760, %v6018_v2  ;;  %v1219_v45 = vand.u32 4294901760, %v1218_v31  ;;  %v7489_v13 = vand.u32 4294901760, %v5978_v16  ;;  %v7490_v22 = vand.u32 4294901760, %v5980_v51 }
  0xa8   :  { %4721 = vmatpush3.bf16.msra.mxu1 %v5939_v23  ;;  %4699 = vmatprep.subr.bf16.mxu0 %v5923_v46  ;;  %v6057_v46 = vsub.f32 %v43_v54, %v6029_v27  ;;  %v1345_v34 = vand.u32 4294901760, %v1344_v56  ;;  %v6072_v54 = vsub.f32 %v6020_v42, %v1092_v44  ;;  %v7491_v31 = vand.u32 4294901760, %v5999_v6 }
  0xa9   :  { %4723 = vmatprep.subr.bf16.mxu1 %v5948_v5  ;;  %v1352_v5 = vand.u32 4294901760, %v1351_v59  ;;  %v1232_v15 = vsub.f32 %v5978_v16, %v7489_v13  ;;  %v1239_v23 = vsub.f32 %v5980_v51, %v7490_v22  ;;  %v6069_v48 = vsub.f32 %v6018_v2, %v1089_v49 }
  0xaa   :  { %v1358_v28 = vsub.f32 %v5999_v6, %v7491_v31  ;;  %v1371_v59 = vand.u32 4294901760, %v6049_v41  ;;  %v7492_v42 = vand.u32 4294901760, %v5958_v8  ;;  %v6088_v22 = vpack.c.bf16 %v1140_v39, %v1137_v47 }
  0xab   :  { %4701 = vmatpush3.bf16.msra.mxu0 %v5950_v61  ;;  %v4732_v53 = vpack.c.bf16 %v1226_v50, %v1219_v45  ;;  %v4734_v31 = vpack.c.bf16 %v1352_v5, %v1345_v34  ;;  %v1233_v56 = vand.u32 4294901760, %v1232_v15  ;;  %v7494_v8 = vand.u32 4294901760, %v6043_v36 }
  0xac   :  { %4725 = vmatpush3.bf16.msra.mxu1 %v5970_v24  ;;  %4703 = vmatprep.subr.bf16.mxu0 %v5955_v32  ;;  %v1365_v24 = vsub.f32 %v6007_v62, %v7322_v29  ;;  %v6086_v13 = vpack.c.bf16 %v1086_v37, %v7492_v42  ;;  %v1240_v32 = vand.u32 4294901760, %v1239_v23  ;;  %v7493_v29 = vand.u32 4294901760, %v6014_v58 }
  0xad   :  { %4727 = vmatprep.subr.bf16.mxu1 %v4726_v4  ;;  %v1150_v4 = vand.u32 4294901760, %v6057_v46  ;;  %v1253_v47 = vsub.f32 %v6043_v36, %v7494_v8  ;;  %v7323_v37 = vand.u32 4294901760, %v6069_v48  ;;  %v7324_v39 = vand.u32 4294901760, %v6072_v54 }
  0xae   :  { %v1246_v2 = vsub.f32 %v6014_v58, %v7493_v29  ;;  %v1359_v45 = vand.u32 4294901760, %v1358_v28  ;;  %v1366_v34 = vand.u32 4294901760, %v1365_v24  ;;  %v1372_v15 = vsub.f32 %v6049_v41, %v1371_v59 }
  0xaf   :  { %4705 = vmatpush3.bf16.msra.mxu0 %v5972_v20  ;;  %v1151_v29 = vsub.f32 %v6057_v46, %v1150_v4  ;;  %v6111_v50 = vpack.c.bf16 %v1092_v44, %v1089_v49  ;;  %v4736_v5 = vpack.c.bf16 %v1240_v32, %v1233_v56  ;;  %v1254_v24 = vand.u32 4294901760, %v1253_v47 }
  0xb0   :  { %4729 = vmatpush3.bf16.msra.mxu1 %v4728_v57  ;;  %4707 = vmatprep.subr.bf16.mxu0 %v6005_v55  ;;  %v7495_v57 = vand.u32 4294901760, %v6052_v1  ;;  %v1247_v28 = vand.u32 4294901760, %v1246_v2  ;;  %v1260_v42 = vsub.f32 %v6069_v48, %v7323_v37  ;;  %v1267_v8 = vsub.f32 %v6072_v54, %v7324_v39 }
  0xb1   :  { %4731 = vmatprep.subr.bf16.mxu1 %v4730_v11  ;;  %v4746_v11 = vpack.c.bf16 %v5757_v12, %v5755_v43  ;;  %v4738_v49 = vpack.c.bf16 %v1366_v34, %v1359_v45  ;;  %v1373_v44 = vand.u32 4294901760, %v1372_v15  ;;  %v1152_v56 = vand.u32 4294901760, %v1151_v29  ;;  %v7496_v29 = vld [vmem:[#allocation11_spill] sm:$0xff] }
  0xb2   :  { %v1379_v23 = vsub.f32 %v6052_v1, %v7495_v57  ;;  %v4740_v2 = vpack.c.bf16 %v1254_v24, %v1247_v28  ;;  %v4750_v47 = vpack.c.bf16 %v5817_v25, %v5815_v21  ;;  %v1261_v57 = vand.u32 4294901760, %v1260_v42  ;;  %v7499_v24 = vld [vmem:[#allocation16_spill] sm:$0xff]  ;;  %v7500_v42 = vld [vmem:[#allocation21_spill] sm:$0xff] }
  0xb3   :  { %4709 = vmatpush3.bf16.msra.mxu0 %v6086_v13  ;;  %v1268_v37 = vand.u32 4294901760, %v1267_v8  ;;  %v4754_v34 = vpack.c.bf16 %v5845_v63, %v5843_v3  ;;  %v4756_v15 = vpack.c.bf16 %v5858_v10, %v5856_v60  ;;  %v4764_v28 = vpack.c.bf16 %v5952_v52, %v5941_v30  ;;  %v7501_v8 = vld [vmem:[#allocation22_spill] sm:$0xff] }
  0xb4   :  { %4733 = vmatpush3.bf16.msra.mxu1 %v4732_v53  ;;  %4711 = vmatprep.subr.bf16.mxu0 %v6088_v22  ;;  %v1380_v32 = vand.u32 4294901760, %v1379_v23  ;;  %v4748_v53 = vpack.c.bf16 %v5761_v33, %v5759_v7  ;;  %v4758_v23 = vpack.c.bf16 %v5876_v9, %v5874_v26 }
  0xb5   :  { %4735 = vmatprep.subr.bf16.mxu1 %v4734_v31  ;;  %v4752_v31 = vpack.c.bf16 %v5829_v38, %v5824_v40  ;;  %v4744_v45 = vpack.c.bf16 %v1268_v37, %v1261_v57  ;;  %v4760_v37 = vpack.c.bf16 %v5903_v18, %v5901_v14  ;;  %v4774_v57 = vpack.c.bf16 %v6052_v1, %v6049_v41 }
  0xb6   :  { %v4742_v39 = vpack.c.bf16 %v1380_v32, %v1373_v44  ;;  %v7502_v44 = vld [vmem:[#allocation14_spill] sm:$0xff]  ;;  %v4768_v32 = vpack.c.bf16 %v5980_v51, %v5978_v16 }
  0xb7   :  { %4713 = vmatpush3.bf16.msra.mxu0 %v6111_v50 }
  0xb8   :  { %4737 = vmatpush3.bf16.msra.mxu1 %v4736_v5  ;;  %4747 = vmatprep.subr.bf16.mxu0 %v4746_v11  ;;  %v7497_v5 = vld [vmem:[#allocation12_spill] sm:$0xff]  ;;  %v7498_v11 = vand.u32 4294901760, %v5848_v0 }
  0xb9   :  { %4739 = vmatprep.subr.bf16.mxu1 %v4738_v49  ;;  %v4766_v49 = vpack.c.bf16 %v7501_v8, %v7500_v42 }
  0xba   :  { %1153 = vmatmul.mubr.f32.vlgmr.msra.gmra.mrb[6].mxu0 %v1152_v56  ;;  %v7503_v56 = vld [vmem:[#allocation15_spill] sm:$0xff] }
  0xbb   :  { %4749 = vmatpush3.bf16.msra.mxu0 %v4748_v53  ;;  %1520 = vmatprep.mubr.f32.mxu0 %v5848_v0  ;;  %v4770_v0 = vpack.c.bf16 %v6007_v62, %v5999_v6  ;;  %v7504_v53 = vld [vmem:[#allocation17_spill] sm:$0xff] }
  0xbc   :  { %4741 = vmatpush3.bf16.msra.mxu1 %v4740_v2  ;;  %4751 = vmatprep.subr.bf16.mxu0 %v4750_v47  ;;  %v4772_v2 = vpack.c.bf16 %v6043_v36, %v6014_v58  ;;  %v7505_v47 = vld [vmem:[#allocation18_spill] sm:$0xff] }
  0xbd   :  { %4743 = vmatprep.subr.bf16.mxu1 %v4742_v39  ;;  %v4762_v39 = vpack.c.bf16 %v5929_v17, %v5911_v35 }
  0xbf   :  { %4753 = vmatpush3.bf16.msra.mxu0 %v4752_v31  ;;  %v7506_v31 = vld [vmem:[#allocation19_spill] sm:$0xff] }
  0xc0   :  { %4745 = vmatpush3.bf16.msra.mxu1 %v4744_v45  ;;  %4755 = vmatprep.subr.bf16.mxu0 %v4754_v34  ;;  %v4776_v45 = vpack.c.bf16 %v6072_v54, %v6069_v48  ;;  %v7507_v34 = vand.u32 4294901760, %v5755_v43  ;;  %v129_v43 = vld [vmem:[#allocation5 + $0x280] sm:$0xff] }
  0xc1   :  { %4779 = vmatprep.subr.bf16.mxu1 %v5803_v19 }
  0xc3   :  { %1385 = vmatmul.mubr.f32.vlgmr.msra.gmra.mrb[6].mxu1 %v6029_v27  ;;  %4757 = vmatpush3.bf16.msra.mxu0 %v4756_v15  ;;  %v7508_v15 = vand.u32 4294901760, %v5757_v12  ;;  %v7514_v12 = vand.u32 4294901760, %v5824_v40  ;;  %v7519_v40 = vand.u32 4294901760, %v5856_v60  ;;  %v7523_v60 = vand.u32 4294901760, %v5901_v14 }
  0xc4   :  { %4781 = vmatpush3.bf16.msra.mxu1 %v7496_v29  ;;  %4759 = vmatprep.subr.bf16.mxu0 %v4758_v23  ;;  %v7530_v14 = vand.u32 4294901760, %v7501_v8 }
  0xc5   :  { %4783 = vmatprep.subr.bf16.mxu1 %v7497_v5  ;;  %1627 = vmatprep.mubr.f32.mxu1 %v7498_v11  ;;  %v4810_v23 = vpack.c.bf16 %v7508_v15, %v7507_v34  ;;  %v7511_v11 = vand.u32 4294901760, %v5761_v33  ;;  %v1957_v34 = vand.u32 4294901760, %v129_v43  ;;  %v113_v15 = vld [vmem:[#allocation5 + $0x200] sm:$0xff] }
  0xc7   :  { %4761 = vmatpush3.bf16.msra.mxu0 %v4760_v37  ;;  %v7509_v37 = vld [vmem:[#allocation20_spill] sm:$0xff] }
  0xc8   :  { %4785 = vmatpush3.bf16.msra.mxu1 %v7499_v24  ;;  %4763 = vmatprep.subr.bf16.mxu0 %v4762_v39  ;;  %v7510_v39 = vand.u32 4294901760, %v5759_v7  ;;  %v7515_v7 = vand.u32 4294901760, %v5829_v38  ;;  %v7520_v38 = vand.u32 4294901760, %v5858_v10  ;;  %v7524_v10 = vand.u32 4294901760, %v5903_v18 }
  0xc9   :  { %4787 = vmatprep.subr.bf16.mxu1 %v7502_v44 }
  0xca   :  { %v4816_v33 = vpack.c.bf16 %v7515_v7, %v7514_v12  ;;  %v4824_v7 = vpack.c.bf16 %v7524_v10, %v7523_v60  ;;  %v134_v10 = vld [vmem:[#allocation5 + $0x2a8] sm:$0xff] }
  0xcb   :  { %4765 = vmatpush3.bf16.msra.mxu0 %v4764_v28  ;;  %v4812_v28 = vpack.c.bf16 %v7511_v11, %v7510_v39  ;;  %v4820_v39 = vpack.c.bf16 %v7520_v38, %v7519_v40  ;;  %v116_v40 = vld [vmem:[#allocation5 + $0x218] sm:$0xff]  ;;  %v7528_v38 = vand.u32 4294901760, %v5952_v52  ;;  %v7533_v52 = vand.u32 4294901760, %v5999_v6 }
  0xcc   :  { %4789 = vmatpush3.bf16.msra.mxu1 %v7503_v56  ;;  %4767 = vmatprep.subr.bf16.mxu0 %v4766_v49  ;;  %v7512_v49 = vand.u32 4294901760, %v5815_v21  ;;  %v7517_v21 = vand.u32 4294901760, %v5843_v3  ;;  %v7521_v3 = vand.u32 4294901760, %v5874_v26  ;;  %v115_v26 = vld [vmem:[#allocation5 + $0x210] sm:$0xff]  ;;  %v7535_v6 = vand.u32 4294901760, %v6014_v58 }
  0xcd   :  { %4791 = vmatprep.subr.bf16.mxu1 %v7504_v53  ;;  %v7539_v58 = vand.u32 4294901760, %v6072_v54 }
  0xcf   :  { %4769 = vmatpush3.bf16.msra.mxu0 %v4768_v32  ;;  %v7513_v32 = vand.u32 4294901760, %v5817_v25  ;;  %v7518_v25 = vand.u32 4294901760, %v5845_v63  ;;  %v7522_v63 = vand.u32 4294901760, %v5876_v9  ;;  %v7527_v9 = vand.u32 4294901760, %v5941_v30 }
  0xd0   :  { %4793 = vmatpush3.bf16.msra.mxu1 %v7505_v47  ;;  %4771 = vmatprep.subr.bf16.mxu0 %v4770_v0  ;;  %v7532_v30 = vand.u32 4294901760, %v5980_v51  ;;  %v46_v51 = vld [vmem:[#allocation2 + $0x28] sm:$0xff] }
  0xd1   :  { %4795 = vmatprep.subr.bf16.mxu1 %v7506_v31  ;;  %v4814_v0 = vpack.c.bf16 %v7513_v32, %v7512_v49  ;;  %v132_v49 = vld [vmem:[#allocation5 + $0x298] sm:$0xff]  ;;  %v4822_v32 = vpack.c.bf16 %v7522_v63, %v7521_v3  ;;  %v4828_v3 = vpack.c.bf16 %v7528_v38, %v7527_v9 }
  0xd2   :  { %v1966_v60 = vand.u32 4294901760, %v132_v49 }
  0xd3   :  { %4773 = vmatpush3.bf16.msra.mxu0 %v4772_v2  ;;  %v7516_v2 = vld [vmem:[#allocation13_spill] sm:$0xff] }
  0xd4   :  { %4797 = vmatpush3.bf16.msra.mxu1 %v5950_v61  ;;  %4775 = vmatprep.subr.bf16.mxu0 %v4774_v57  ;;  %v4818_v57 = vpack.c.bf16 %v7518_v25, %v7517_v21  ;;  %v7526_v21 = vand.u32 4294901760, %v5929_v17  ;;  %v7531_v17 = vand.u32 4294901760, %v5978_v16  ;;  %v1915_v16 = vand.u32 4294901760, %v115_v26 }
  0xd5   :  { %4799 = vmatprep.subr.bf16.mxu1 %v7509_v37  ;;  %v6266_v38 = vsub.f32 %v132_v49, %v1966_v60  ;;  %v136_v49 = vld [vmem:[#allocation5 + $0x2b8] sm:$0xff] }
  0xd7   :  { %4777 = vmatpush3.bf16.msra.mxu0 %v4776_v45  ;;  %v130_v45 = vld [vmem:[#allocation5 + $0x288] sm:$0xff] }
  0xd8   :  { %4801 = vmatpush3.bf16.msra.mxu1 %v5972_v20  ;;  %4811 = vmatprep.subr.bf16.mxu0 %v4810_v23  ;;  %v114_v23 = vld [vmem:[#allocation5 + $0x208] sm:$0xff]  ;;  %v1960_v11 = vand.u32 4294901760, %v130_v45 }
  0xd9   :  { %4803 = vmatprep.subr.bf16.mxu1 %v6005_v55  ;;  %v1912_v12 = vand.u32 4294901760, %v114_v23 }
  0xda   :  { %1523 = vmatmul.mubr.f32.vlgmr.msra.gmra.mrb[8].mxu0 %v6057_v46 }
  0xdb   :  { %4813 = vmatpush3.bf16.msra.mxu0 %v4812_v28  ;;  %1797 = vmatprep.mubr.f32.mxu0 %v7516_v2  ;;  %v131_v28 = vld [vmem:[#allocation5 + $0x290] sm:$0xff] }
  0xdc   :  { %4805 = vmatpush3.bf16.msra.mxu1 %v6086_v13  ;;  %4815 = vmatprep.subr.bf16.mxu0 %v4814_v0  ;;  %v1909_v0 = vand.u32 4294901760, %v113_v15  ;;  %v1963_v63 = vand.u32 4294901760, %v131_v28 }
  0xdd   :  { %4807 = vmatprep.subr.bf16.mxu1 %v6088_v22 }
  0xde   :  { %v6239_v46 = vsub.f32 %v113_v15, %v1909_v0 }
  0xdf   :  { %4817 = vmatpush3.bf16.msra.mxu0 %v4816_v33  ;;  %v7525_v33 = vand.u32 4294901760, %v5911_v35  ;;  %v133_v35 = vld [vmem:[#allocation5 + $0x2a0] sm:$0xff] }
  0xe0   :  { %4809 = vmatpush3.bf16.msra.mxu1 %v6111_v50  ;;  %4819 = vmatprep.subr.bf16.mxu0 %v4818_v57  ;;  %v6212_v57 = vsub.f32 %v129_v43, %v1957_v34  ;;  %v6228_v43 = vpack.c.bf16 %v7532_v30, %v7531_v17  ;;  %v7325_v17 = vand.u32 4294901760, %v6266_v38 }
  0xe1   :  { %4843 = vmatprep.subr.bf16.mxu1 %v5803_v19  ;;  %v4826_v25 = vpack.c.bf16 %v7526_v21, %v7525_v33  ;;  %v7529_v19 = vand.u32 4294901760, %v7500_v42  ;;  %v7534_v42 = vand.u32 4294901760, %v6007_v62  ;;  %v6236_v33 = vsub.f32 %v130_v45, %v1960_v11 }
  0xe2   :  { %v7536_v62 = vand.u32 4294901760, %v6043_v36  ;;  %v1969_v45 = vand.u32 4294901760, %v133_v35  ;;  %v7335_v15 = vand.u32 4294901760, %v6212_v57  ;;  %v6264_v36 = vsub.f32 %v131_v28, %v1963_v63 }
  0xe3   :  { %v4830_v18 = vpack.c.bf16 %v7530_v14, %v7529_v19  ;;  %1631 = vmatmul.mubr.f32.vlgmr.msra.gmra.mrb[8].mxu1 %v1150_v4  ;;  %4821 = vmatpush3.bf16.msra.mxu0 %v4820_v39  ;;  %v6234_v8 = vpack.c.bf16 %v7534_v42, %v7533_v52  ;;  %v6241_v4 = vsub.f32 %v114_v23, %v1912_v12  ;;  %v1918_v39 = vand.u32 4294901760, %v116_v40 }
  0xe4   :  { %4845 = vmatpush3.bf16.msra.mxu1 %v7496_v29  ;;  %4823 = vmatprep.subr.bf16.mxu0 %v4822_v32  ;;  %v6248_v21 = vpack.c.bf16 %v7536_v62, %v7535_v6  ;;  %v1972_v29 = vand.u32 4294901760, %v134_v10  ;;  %v7537_v23 = vand.u32 4294901760, %v6052_v1  ;;  %v6270_v19 = vpack.c.bf16 %v1912_v12, %v1909_v0  ;;  %v117_v1 = vld [vmem:[#allocation5 + $0x220] sm:$0xff] }
  0xe5   :  { %4847 = vmatprep.subr.bf16.mxu1 %v7497_v5  ;;  %1901 = vmatprep.mubr.f32.mxu1 %v7516_v2  ;;  %v7538_v5 = vand.u32 4294901760, %v6069_v48  ;;  %v6268_v2 = vpack.c.bf16 %v1960_v11, %v1957_v34  ;;  %v7333_v41 = vand.u32 4294901760, %v6236_v33  ;;  %v6273_v14 = vand.u32 4294901760, %v46_v51  ;;  %v135_v11 = vld [vmem:[#allocation5 + $0x2b0] sm:$0xff] }
  0xe6   :  { %v6256_v32 = vpack.c.bf16 %v7537_v23, %v1371_v59  ;;  %7540 = vst [vmem:[#allocation11_spill] sm:$0xff] %v6270_v19  ;;  %v118_v59 = vld [vmem:[#allocation5 + $0x228] sm:$0xff]  ;;  %v6276_v48 = vpack.c.bf16 %v1966_v60, %v1963_v63  ;;  %v6278_v54 = vpack.c.bf16 %v1918_v39, %v1915_v16  ;;  %v7330_v28 = vand.u32 4294901760, %v6239_v46 }
  0xe7   :  { %v6262_v9 = vpack.c.bf16 %v7539_v58, %v7538_v5  ;;  %4825 = vmatpush3.bf16.msra.mxu0 %v4824_v7  ;;  %7541 = vst [vmem:[#allocation12_spill] sm:$0xff] %v6273_v14  ;;  %v7329_v34 = vand.u32 4294901760, %v6241_v4  ;;  %v6283_v0 = vsub.f32 %v115_v26, %v1915_v16  ;;  %v6285_v12 = vsub.f32 %v116_v40, %v1918_v39 }
  0xe8   :  { %4849 = vmatpush3.bf16.msra.mxu1 %v7499_v24  ;;  %4827 = vmatprep.subr.bf16.mxu0 %v4826_v25  ;;  %7542 = vst [vmem:[#allocation16_spill] sm:$0xff] %v6276_v48  ;;  %7543 = vst [vmem:[#allocation21_spill] sm:$0xff] %v6278_v54  ;;  %v6287_v7 = vpack.c.bf16 %v1972_v29, %v1969_v45  ;;  %v2136_v24 = vsub.f32 %v6212_v57, %v7335_v15  ;;  %v1921_v25 = vand.u32 4294901760, %v117_v1 }
  0xe9   :  { %4851 = vmatprep.subr.bf16.mxu1 %v7502_v44  ;;  %v1924_v63 = vand.u32 4294901760, %v118_v59  ;;  %v7326_v60 = vand.u32 4294901760, %v6264_v36  ;;  %v2143_v44 = vsub.f32 %v6236_v33, %v7333_v41  ;;  %v1975_v26 = vand.u32 4294901760, %v135_v11 }
  0xea   :  { %7544 = vst [vmem:[#allocation22_spill] sm:$0xff] %v6287_v7  ;;  %v1978_v40 = vand.u32 4294901760, %v136_v49  ;;  %v6298_v30 = vsub.f32 %v46_v51, %v6273_v14  ;;  %v6301_v52 = vsub.f32 %v133_v35, %v1969_v45  ;;  %v2024_v42 = vsub.f32 %v6239_v46, %v7330_v28  ;;  %v119_v51 = vld [vmem:[#allocation5 + $0x230] sm:$0xff]  ;;  %v122_v28 = vld [vmem:[#allocation5 + $0x248] sm:$0xff] }
  0xeb   :  { %4829 = vmatpush3.bf16.msra.mxu0 %v4828_v3  ;;  %v2031_v3 = vsub.f32 %v6241_v4, %v7329_v34  ;;  %v6310_v16 = vsub.f32 %v134_v10, %v1972_v29  ;;  %v2137_v39 = vand.u32 4294901760, %v2136_v24  ;;  %v7328_v6 = vand.u32 4294901760, %v6283_v0  ;;  %v120_v10 = vld [vmem:[#allocation5 + $0x238] sm:$0xff] }
  0xec   :  { %4853 = vmatpush3.bf16.msra.mxu1 %v7503_v56  ;;  %4831 = vmatprep.subr.bf16.mxu0 %v4830_v18  ;;  %v7327_v56 = vand.u32 4294901760, %v6285_v12  ;;  %v6314_v18 = vpack.c.bf16 %v1924_v63, %v1921_v25  ;;  %v6316_v35 = vsub.f32 %v117_v1, %v1921_v25  ;;  %v2150_v62 = vsub.f32 %v6264_v36, %v7326_v60  ;;  %v138_v60 = vld [vmem:[#allocation5 + $0x2c8] sm:$0xff] }
  0xed   :  { %4855 = vmatprep.subr.bf16.mxu1 %v7504_v53  ;;  %v2157_v53 = vsub.f32 %v6266_v38, %v7325_v17  ;;  %v2144_v45 = vand.u32 4294901760, %v2143_v44  ;;  %v6325_v29 = vsub.f32 %v118_v59, %v1924_v63  ;;  %v6327_v23 = vpack.c.bf16 %v1978_v40, %v1975_v26  ;;  %v137_v17 = vld [vmem:[#allocation5 + $0x2c0] sm:$0xff] }
  0xee   :  { %7545 = vst [vmem:[#allocation14_spill] sm:$0xff] %v6314_v18  ;;  %v7336_v5 = vand.u32 4294901760, %v6298_v30  ;;  %v2025_v58 = vand.u32 4294901760, %v2024_v42  ;;  %v2032_v1 = vand.u32 4294901760, %v2031_v3  ;;  %v6332_v24 = vsub.f32 %v135_v11, %v1975_v26  ;;  %v121_v42 = vld [vmem:[#allocation5 + $0x240] sm:$0xff] }
  0xef   :  { %4833 = vmatpush3.bf16.msra.mxu0 %v6228_v43  ;;  %7546 = vst [vmem:[#allocation15_spill] sm:$0xff] %v6327_v23  ;;  %v1927_v25 = vand.u32 4294901760, %v119_v51  ;;  %v6335_v43 = vsub.f32 %v136_v49, %v1978_v40  ;;  %v1930_v59 = vand.u32 4294901760, %v120_v10  ;;  %v2038_v63 = vsub.f32 %v6283_v0, %v7328_v6 }
  0xf0   :  { %4857 = vmatpush3.bf16.msra.mxu1 %v7505_v47  ;;  %4835 = vmatprep.subr.bf16.mxu0 %v6234_v8  ;;  %v2045_v47 = vsub.f32 %v6285_v12, %v7327_v56  ;;  %v2151_v8 = vand.u32 4294901760, %v2150_v62  ;;  %v2158_v44 = vand.u32 4294901760, %v2157_v53  ;;  %v7332_v11 = vand.u32 4294901760, %v6301_v52 }
  0xf1   :  { %4859 = vmatprep.subr.bf16.mxu1 %v7506_v31  ;;  %v7331_v26 = vand.u32 4294901760, %v6310_v16  ;;  %v6346_v31 = vpack.c.bf16 %v2144_v45, %v2137_v39  ;;  %v1981_v49 = vand.u32 4294901760, %v137_v17  ;;  %v1984_v40 = vand.u32 4294901760, %v138_v60 }
  0xf2   :  { %v2007_v3 = vsub.f32 %v6298_v30, %v7336_v5  ;;  %v6353_v62 = vpack.c.bf16 %v2032_v1, %v2025_v58  ;;  %v6355_v53 = vsub.f32 %v119_v51, %v1927_v25  ;;  %v7334_v56 = vand.u32 4294901760, %v6316_v35  ;;  %v140_v1 = vld [vmem:[#allocation5 + $0x2d8] sm:$0xff] }
  0xf3   :  { %4837 = vmatpush3.bf16.msra.mxu0 %v6248_v21  ;;  %v7337_v21 = vand.u32 4294901760, %v6325_v29  ;;  %v6360_v39 = vpack.c.bf16 %v1930_v59, %v1927_v25  ;;  %v6362_v45 = vsub.f32 %v120_v10, %v1930_v59  ;;  %v2039_v6 = vand.u32 4294901760, %v2038_v63  ;;  %v139_v10 = vld [vmem:[#allocation5 + $0x2d0] sm:$0xff]  ;;  %v124_v5 = vld [vmem:[#allocation5 + $0x258] sm:$0xff] }
  0xf4   :  { %4861 = vmatpush3.bf16.msra.mxu1 %v5950_v61  ;;  %4839 = vmatprep.subr.bf16.mxu0 %v6256_v32  ;;  %v2046_v34 = vand.u32 4294901760, %v2045_v47  ;;  %v6364_v61 = vpack.c.bf16 %v2158_v44, %v2151_v8  ;;  %v2164_v32 = vsub.f32 %v6301_v52, %v7332_v11  ;;  %v2171_v51 = vsub.f32 %v6310_v16, %v7331_v26 }
  0xf5   :  { %4863 = vmatprep.subr.bf16.mxu1 %v7509_v37  ;;  %7547 = vst [vmem:[#allocation17_spill] sm:$0xff] %v6360_v39  ;;  %v1933_v58 = vand.u32 4294901760, %v121_v42  ;;  %v6373_v37 = vpack.c.bf16 %v1984_v40, %v1981_v49  ;;  %v7339_v25 = vand.u32 4294901760, %v6332_v24  ;;  %v7338_v59 = vand.u32 4294901760, %v6335_v43 }
  0xf6   :  { %v2008_v63 = vand.u32 4294901760, %v2007_v3  ;;  %v6379_v47 = vsub.f32 %v137_v17, %v1981_v49  ;;  %v1936_v8 = vand.u32 4294901760, %v122_v28  ;;  %v2059_v44 = vsub.f32 %v6325_v29, %v7337_v21 }
  0xf7   :  { %4841 = vmatpush3.bf16.msra.mxu0 %v6262_v9  ;;  %7548 = vst [vmem:[#allocation18_spill] sm:$0xff] %v6373_v37  ;;  %v2052_v9 = vsub.f32 %v6316_v35, %v7334_v56  ;;  %v6388_v26 = vpack.c.bf16 %v2046_v34, %v2039_v6  ;;  %v6390_v3 = vsub.f32 %v138_v60, %v1984_v40  ;;  %v7342_v11 = vand.u32 4294901760, %v6355_v53 }
  0xf8   :  { %4865 = vmatpush3.bf16.msra.mxu1 %v5972_v20  ;;  %4875 = vmatprep.subr.bf16.mxu0 %v6268_v2  ;;  %v123_v20 = vld [vmem:[#allocation5 + $0x250] sm:$0xff]  ;;  %v7345_v17 = vand.u32 4294901760, %v6362_v45  ;;  %v2165_v49 = vand.u32 4294901760, %v2164_v32  ;;  %v2172_v41 = vand.u32 4294901760, %v2171_v51  ;;  %v1987_v56 = vand.u32 4294901760, %v139_v10 }
  0xf9   :  { %4867 = vmatprep.subr.bf16.mxu1 %v6005_v55  ;;  %v1990_v15 = vand.u32 4294901760, %v140_v1  ;;  %v6396_v21 = vsub.f32 %v121_v42, %v1933_v58  ;;  %v2178_v55 = vsub.f32 %v6332_v24, %v7339_v25  ;;  %v2185_v34 = vsub.f32 %v6335_v43, %v7338_v59  ;;  %v141_v59 = vld [vmem:[#allocation5 + $0x2e0] sm:$0xff] }
  0xfa   :  { %1799 = vmatmul.mubr.f32.vlgmr.msra.gmra.mrb[10].mxu0 %v6029_v27  ;;  %v6406_v60 = vpack.c.bf16 %v1936_v8, %v1933_v58  ;;  %v2053_v6 = vand.u32 4294901760, %v2052_v9  ;;  %v2060_v40 = vand.u32 4294901760, %v2059_v44  ;;  %v1939_v32 = vand.u32 4294901760, %v123_v20  ;;  %v6434_v25 = vld [vmem:[#allocation5 + $0x260] sm:$0xff] }
  0xfb   :  { %4877 = vmatpush3.bf16.msra.mxu0 %v6270_v19  ;;  %2009 = vmatprep.mubr.f32.mxu0 %v2008_v63  ;;  %v1942_v42 = vand.u32 4294901760, %v124_v5  ;;  %v2066_v51 = vsub.f32 %v6355_v53, %v7342_v11  ;;  %v2073_v63 = vsub.f32 %v6362_v45, %v7345_v17  ;;  %v6416_v58 = vpack.c.bf16 %v2172_v41, %v2165_v49 }
  0xfc   :  { %4869 = vmatpush3.bf16.msra.mxu1 %v6086_v13  ;;  %4879 = vmatprep.subr.bf16.mxu0 %v6276_v48  ;;  %v142_v13 = vld [vmem:[#allocation5 + $0x2e8] sm:$0xff]  ;;  %v6418_v9 = vsub.f32 %v122_v28, %v1936_v8  ;;  %v6420_v44 = vpack.c.bf16 %v1990_v15, %v1987_v56  ;;  %v6424_v48 = vsub.f32 %v139_v10, %v1987_v56  ;;  %v2179_v19 = vand.u32 4294901760, %v2178_v55 }
  0xfd   :  { %4871 = vmatprep.subr.bf16.mxu1 %v6088_v22  ;;  %v7346_v22 = vand.u32 4294901760, %v6390_v3  ;;  %v6426_v11 = vsub.f32 %v140_v1, %v1990_v15  ;;  %v2186_v17 = vand.u32 4294901760, %v2185_v34  ;;  %v6430_v41 = vpack.c.bf16 %v2060_v40, %v2053_v6  ;;  %v6442_v55 = vld [vmem:[#allocation5 + $0x268] sm:$0xff]  ;;  %v6451_v40 = vld [vmem:[#allocation5 + $0x2f0] sm:$0xff] }
  0xfe   :  { %7549 = vst [vmem:[#allocation19_spill] sm:$0xff] %v6424_v48  ;;  %v6432_v28 = vsub.f32 %v123_v20, %v1939_v32  ;;  %v1993_v8 = vand.u32 4294901760, %v141_v59  ;;  %v1996_v49 = vand.u32 4294901760, %v142_v13  ;;  %v6437_v56 = vpack.c.bf16 %v1942_v42, %v1939_v32  ;;  %v6453_v32 = vld [vmem:[#allocation5 + $0x2f8] sm:$0xff] }
  0xff   :  { %4881 = vmatpush3.bf16.msra.mxu0 %v6278_v54  ;;  %7550 = vst [vmem:[#allocation20_spill] sm:$0xff] %v6426_v11  ;;  %v2067_v15 = vand.u32 4294901760, %v2066_v51  ;;  %v2074_v10 = vand.u32 4294901760, %v2073_v63  ;;  %v7551_v1 = vand.u32 4294901760, %v6379_v47  ;;  %v6444_v34 = vsub.f32 %v124_v5, %v1942_v42 }
 0x100   :  { %4873 = vmatpush3.bf16.msra.mxu1 %v6111_v50  ;;  %4883 = vmatprep.subr.bf16.mxu0 %v6287_v7  ;;  %v2199_v20 = vsub.f32 %v6390_v3, %v7346_v22  ;;  %v4918_v51 = vpack.c.bf16 %v2186_v17, %v2179_v19  ;;  %v1945_v5 = vand.u32 4294901760, %v6434_v25  ;;  %v6462_v22 = vpack.c.bf16 %v1996_v49, %v1993_v8 }
 0x101   :  { %4907 = vmatprep.subr.bf16.mxu1 %v6346_v31  ;;  %v2192_v50 = vsub.f32 %v6379_v47, %v7551_v1  ;;  %v45_v1 = vld [vmem:[#allocation2 + $0x20] sm:$0xff]  ;;  %v6464_v31 = vsub.f32 %v141_v59, %v1993_v8  ;;  %v6466_v6 = vsub.f32 %v142_v13, %v1996_v49  ;;  %v4920_v19 = vpack.c.bf16 %v2074_v10, %v2067_v15 }
 0x102   :  { %v1999_v42 = vand.u32 4294901760, %v6451_v40  ;;  %v2002_v63 = vand.u32 4294901760, %v6453_v32  ;;  %v2200_v59 = vand.u32 4294901760, %v2199_v20  ;;  %v7552_v13 = vand.u32 4294901760, %v6396_v21 }
 0x103   :  { %1903 = vmatmul.mubr.f32.vlgmr.msra.gmra.mrb[10].mxu1 %v6029_v27  ;;  %4885 = vmatpush3.bf16.msra.mxu0 %v6314_v18  ;;  %v1948_v27 = vand.u32 4294901760, %v6442_v55  ;;  %v2193_v17 = vand.u32 4294901760, %v2192_v50  ;;  %v6472_v18 = vld [vmem:[#allocation5 + $0x270] sm:$0xff]  ;;  %v7553_v49 = vand.u32 4294901760, %v6418_v9  ;;  %v6483_v15 = vand.u32 4294901760, %v45_v1 }
 0x104   :  { %4909 = vmatpush3.bf16.msra.mxu1 %v6353_v62  ;;  %4887 = vmatprep.subr.bf16.mxu0 %v6327_v23  ;;  %v6474_v62 = vld [vmem:[#allocation5 + $0x278] sm:$0xff]  ;;  %v2080_v8 = vsub.f32 %v6396_v21, %v7552_v13  ;;  %v7555_v10 = vand.u32 4294901760, %v6424_v48  ;;  %v7556_v23 = vand.u32 4294901760, %v6426_v11  ;;  %v6509_v13 = vsub.f32 %v6453_v32, %v2002_v63 }
 0x105   :  { %4911 = vmatprep.subr.bf16.mxu1 %v6364_v61  ;;  %2245 = vmatprep.mubr.f32.mxu1 %v6273_v14  ;;  %v2087_v61 = vsub.f32 %v6418_v9, %v7553_v49  ;;  %7554 = vst [vmem:[#allocation13_spill] sm:$0xff] %v6483_v15  ;;  %v6497_v49 = vsub.f32 %v6434_v25, %v1945_v5  ;;  %v1954_v7 = vand.u32 4294901760, %v6474_v62  ;;  %v7365_v25 = vand.u32 4294901760, %v6466_v6 }
 0x106   :  { %v2206_v50 = vsub.f32 %v6424_v48, %v7555_v10  ;;  %v2213_v20 = vsub.f32 %v6426_v11, %v7556_v23  ;;  %v1951_v10 = vand.u32 4294901760, %v6472_v18  ;;  %v6506_v23 = vsub.f32 %v6451_v40, %v1999_v42 }
 0x107   :  { %4889 = vmatpush3.bf16.msra.mxu0 %v6360_v39  ;;  %v6500_v39 = vsub.f32 %v6442_v55, %v1948_v27  ;;  %v4922_v14 = vpack.c.bf16 %v2200_v59, %v2193_v17  ;;  %v2088_v55 = vand.u32 4294901760, %v2087_v61  ;;  %v6514_v11 = vsub.f32 %v45_v1, %v6483_v15 }
 0x108   :  { %4913 = vmatpush3.bf16.msra.mxu1 %v6388_v26  ;;  %4891 = vmatprep.subr.bf16.mxu0 %v6373_v37  ;;  %v2081_v37 = vand.u32 4294901760, %v2080_v8  ;;  %v2207_v48 = vand.u32 4294901760, %v2206_v50  ;;  %v7557_v40 = vand.u32 4294901760, %v6432_v28  ;;  %v7558_v32 = vand.u32 4294901760, %v6444_v34 }
 0x109   :  { %4915 = vmatprep.subr.bf16.mxu1 %v6416_v58  ;;  %v2214_v58 = vand.u32 4294901760, %v2213_v20  ;;  %v6526_v17 = vsub.f32 %v6472_v18, %v1951_v10  ;;  %v6529_v1 = vsub.f32 %v6474_v62, %v1954_v7  ;;  %v7559_v61 = vand.u32 4294901760, %v6464_v31 }
 0x10a   :  { %v2094_v54 = vsub.f32 %v6432_v28, %v7557_v40  ;;  %v2101_v26 = vsub.f32 %v6444_v34, %v7558_v32  ;;  %v7367_v18 = vand.u32 4294901760, %v6509_v13  ;;  %v6541_v40 = vpack.c.bf16 %v1948_v27, %v1945_v5 }
 0x10b   :  { %4893 = vmatpush3.bf16.msra.mxu0 %v6406_v60  ;;  %v2220_v50 = vsub.f32 %v6464_v31, %v7559_v61  ;;  %v6543_v62 = vpack.c.bf16 %v2002_v63, %v1999_v42  ;;  %v7369_v32 = vand.u32 4294901760, %v6514_v11  ;;  %v4926_v8 = vpack.c.bf16 %v2214_v58, %v2207_v48 }
 0x10c   :  { %4917 = vmatpush3.bf16.msra.mxu1 %v6430_v41  ;;  %4895 = vmatprep.subr.bf16.mxu0 %v6420_v44  ;;  %v2227_v41 = vsub.f32 %v6466_v6, %v7365_v25  ;;  %v2095_v59 = vand.u32 4294901760, %v2094_v54  ;;  %v2102_v61 = vand.u32 4294901760, %v2101_v26  ;;  %v7560_v25 = vand.u32 4294901760, %v6497_v49 }
 0x10d   :  { %4919 = vmatprep.subr.bf16.mxu1 %v4918_v51  ;;  %v4924_v51 = vpack.c.bf16 %v2088_v55, %v2081_v37  ;;  %v7561_v5 = vand.u32 4294901760, %v6500_v39  ;;  %v7366_v63 = vand.u32 4294901760, %v6526_v17  ;;  %v7368_v27 = vand.u32 4294901760, %v6529_v1 }
 0x10e   :  { %v2108_v20 = vsub.f32 %v6497_v49, %v7560_v25  ;;  %v2221_v37 = vand.u32 4294901760, %v2220_v50  ;;  %v2228_v48 = vand.u32 4294901760, %v2227_v41  ;;  %v7562_v54 = vand.u32 4294901760, %v6506_v23 }
 0x10f   :  { %4897 = vmatpush3.bf16.msra.mxu0 %v6437_v56  ;;  %v2115_v42 = vsub.f32 %v6500_v39, %v7561_v5  ;;  %v2241_v26 = vsub.f32 %v6509_v13, %v7367_v18  ;;  %v2013_v25 = vsub.f32 %v6514_v11, %v7369_v32  ;;  %v6566_v55 = vpack.c.bf16 %v1954_v7, %v1951_v10 }
 0x110   :  { %4921 = vmatpush3.bf16.msra.mxu1 %v4920_v19  ;;  %4899 = vmatprep.subr.bf16.mxu0 %v6462_v22  ;;  %v2234_v19 = vsub.f32 %v6506_v23, %v7562_v54  ;;  %v4928_v58 = vpack.c.bf16 %v2102_v61, %v2095_v59  ;;  %v2109_v50 = vand.u32 4294901760, %v2108_v20  ;;  %v2122_v5 = vsub.f32 %v6526_v17, %v7366_v63 }
 0x111   :  { %4923 = vmatprep.subr.bf16.mxu1 %v4922_v14  ;;  %v4938_v14 = vpack.c.bf16 %v6236_v33, %v6212_v57  ;;  %v2116_v41 = vand.u32 4294901760, %v2115_v42  ;;  %v2129_v54 = vsub.f32 %v6529_v1, %v7368_v27  ;;  %v4930_v7 = vpack.c.bf16 %v2228_v48, %v2221_v37 }
 0x112   :  { %v2235_v10 = vand.u32 4294901760, %v2234_v19  ;;  %v2242_v59 = vand.u32 4294901760, %v2241_v26  ;;  %v2014_v61 = vand.u32 4294901760, %v2013_v25  ;;  %v4942_v42 = vpack.c.bf16 %v6266_v38, %v6264_v36  ;;  %v7564_v25 = vld [vmem:[#allocation16_spill] sm:$0xff] }
 0x113   :  { %4901 = vmatpush3.bf16.msra.mxu0 %v6541_v40  ;;  %v4932_v20 = vpack.c.bf16 %v2116_v41, %v2109_v50  ;;  %v2123_v63 = vand.u32 4294901760, %v2122_v5  ;;  %v2130_v18 = vand.u32 4294901760, %v2129_v54  ;;  %v4946_v48 = vpack.c.bf16 %v6310_v16, %v6301_v52  ;;  %v7566_v50 = vld [vmem:[#allocation21_spill] sm:$0xff]  ;;  %v7567_v41 = vld [vmem:[#allocation19_spill] sm:$0xff]  ;;  %v7568_v5 = vld [vmem:[#allocation20_spill] sm:$0xff] }
 0x114   :  { %4925 = vmatpush3.bf16.msra.mxu1 %v4924_v51  ;;  %4903 = vmatprep.subr.bf16.mxu0 %v6543_v62  ;;  %v4940_v51 = vpack.c.bf16 %v6241_v4, %v6239_v46  ;;  %v4934_v27 = vpack.c.bf16 %v2242_v59, %v2235_v10  ;;  %v4948_v19 = vpack.c.bf16 %v6325_v29, %v6316_v35  ;;  %v7570_v59 = vld [vmem:[#allocation14_spill] sm:$0xff]  ;;  %v7577_v32 = vand.u32 4294901760, %v6241_v4 }
 0x115   :  { %4927 = vmatprep.subr.bf16.mxu1 %v4926_v8  ;;  %v4944_v8 = vpack.c.bf16 %v6285_v12, %v6283_v0  ;;  %v4936_v37 = vpack.c.bf16 %v2130_v18, %v2123_v63  ;;  %v4950_v26 = vpack.c.bf16 %v6335_v43, %v6332_v24  ;;  %v4952_v18 = vpack.c.bf16 %v6362_v45, %v6355_v53  ;;  %v7563_v63 = vld [vmem:[#allocation11_spill] sm:$0xff] }
 0x116   :  { %v4958_v54 = vpack.c.bf16 %v7568_v5, %v7567_v41  ;;  %v4960_v10 = vpack.c.bf16 %v6444_v34, %v6432_v28 }
 0x117   :  { %4905 = vmatpush3.bf16.msra.mxu0 %v6566_v55 }
 0x118   :  { %4929 = vmatpush3.bf16.msra.mxu1 %v4928_v58  ;;  %4939 = vmatprep.subr.bf16.mxu0 %v4938_v14  ;;  %v7565_v58 = vand.u32 4294901760, %v6298_v30  ;;  %v4956_v14 = vpack.c.bf16 %v6418_v9, %v6396_v21 }
 0x119   :  { %4931 = vmatprep.subr.bf16.mxu1 %v4930_v7  ;;  %v7569_v7 = vld [vmem:[#allocation22_spill] sm:$0xff] }
 0x11a   :  { %2015 = vmatmul.mubr.f32.vlgmr.msra.gmra.mrb[12].mxu0 %v2014_v61  ;;  %v7571_v61 = vld [vmem:[#allocation15_spill] sm:$0xff] }
 0x11b   :  { %4941 = vmatpush3.bf16.msra.mxu0 %v4940_v51  ;;  %2382 = vmatprep.mubr.f32.mxu0 %v6298_v30  ;;  %v4962_v30 = vpack.c.bf16 %v6466_v6, %v6464_v31 }
 0x11c   :  { %4933 = vmatpush3.bf16.msra.mxu1 %v4932_v20  ;;  %4943 = vmatprep.subr.bf16.mxu0 %v4942_v42  ;;  %v4964_v42 = vpack.c.bf16 %v6500_v39, %v6497_v49 }
 0x11d   :  { %4935 = vmatprep.subr.bf16.mxu1 %v4934_v27  ;;  %v4954_v27 = vpack.c.bf16 %v6390_v3, %v6379_v47 }
 0x11f   :  { %4945 = vmatpush3.bf16.msra.mxu0 %v4944_v8 }
 0x120   :  { %4937 = vmatpush3.bf16.msra.mxu1 %v4936_v37  ;;  %4947 = vmatprep.subr.bf16.mxu0 %v4946_v48  ;;  %v7572_v37 = vld [vmem:[#allocation17_spill] sm:$0xff]  ;;  %v4966_v48 = vpack.c.bf16 %v6509_v13, %v6506_v23 }
 0x121   :  { %4971 = vmatprep.subr.bf16.mxu1 %v6268_v2 }
 0x123   :  { %2247 = vmatmul.mubr.f32.vlgmr.msra.gmra.mrb[12].mxu1 %v6483_v15  ;;  %4949 = vmatpush3.bf16.msra.mxu0 %v4948_v19  ;;  %v7573_v19 = vld [vmem:[#allocation18_spill] sm:$0xff] }
 0x124   :  { %4973 = vmatpush3.bf16.msra.mxu1 %v7563_v63  ;;  %4951 = vmatprep.subr.bf16.mxu0 %v4950_v26  ;;  %v3649_v26 = vld [vmem:[%s7232_s2] ss:$0 sm:$0xff]  ;;  %s5339_s2 = smov [#allocation7]  }
 0x125   :  { %4975 = vmatprep.subr.bf16.mxu1 %v7564_v25  ;;  %2489 = vmatprep.mubr.f32.mxu1 %v7565_v58  ;;  %v7575_v58 = vand.u32 4294901760, %v6236_v33  ;;  %v7579_v33 = vand.u32 4294901760, %v6266_v38  ;;  %v7581_v38 = vand.u32 4294901760, %v6285_v12  ;;  %s3639_s11 = sshll.u32 %s5339_s2, 4  ;;  %s3640_s11 = int_to_ptr.vmem [resolvable:$true] %s3639_s11 }
 0x126   :  { %s5307_s12 = scalar_lea.vmem %s3640_s11, 128  ;;  %p5312_p3 = scmp.lt.s32.totalorder %s3640_s11, %s3640_s11 }
 0x127   :  { %4953 = vmatpush3.bf16.msra.mxu0 %v4952_v18  ;;  %v4968_v18 = vpack.c.bf16 %v6529_v1, %v6526_v17  ;;  %p5308_p2 = scmp.ne.s32.totalorder %s3640_s11, %s5307_s12  ;;  %p5313_p4 = scmp.lt.s32.totalorder %s5307_s12, %s5307_s12 }
 0x128   :  { %4977 = vmatpush3.bf16.msra.mxu1 %v7566_v50  ;;  %4955 = vmatprep.subr.bf16.mxu0 %v4954_v27  ;;  %v7574_v27 = vand.u32 4294901760, %v6212_v57  ;;  %v7578_v57 = vand.u32 4294901760, %v6264_v36  ;;  %v7580_v36 = vand.u32 4294901760, %v6283_v0 }
 0x129   :  { %4979 = vmatprep.subr.bf16.mxu1 %v7569_v7  ;;  %p5314_p5 = por %p5313_p4, %p5312_p3 }
 0x12b   :  { %4957 = vmatpush3.bf16.msra.mxu0 %v4956_v14  ;;  %v5002_v14 = vpack.c.bf16 %v7575_v58, %v7574_v27  ;;  %v5006_v27 = vpack.c.bf16 %v7579_v33, %v7578_v57  ;;  %v7582_v58 = vld [vmem:[#allocation12_spill] sm:$0xff]  ;;  %p5315_p6 = pnand %p5314_p5, %p5308_p2 }
 0x12c   :  { %4981 = vmatpush3.bf16.msra.mxu1 %v7570_v59  ;;  %4959 = vmatprep.subr.bf16.mxu0 %v4958_v54  ;;  %v6630_v54 = vld [vmem:[#allocation5 + $0x380] sm:$0xff] }
 0x12d   :  { %4983 = vmatprep.subr.bf16.mxu1 %v7571_v61  ;;  %v3682_v51 = vpop.f32.mrb[0].mxu0 }
 0x12e   :  { %v3683_v20 = vpop.f32.mrb[1].mxu0 }
 0x12f   :  { %4961 = vmatpush3.bf16.msra.mxu0 %v4960_v10  ;;  %v3684_v8 = vadd.f32 %v3683_v20, %v3682_v51  ;;  %v6632_v51 = vld [vmem:[#allocation5 + $0x388] sm:$0xff] }
 0x130   :  { %4985 = vmatpush3.bf16.msra.mxu1 %v7572_v37  ;;  %4963 = vmatprep.subr.bf16.mxu0 %v4962_v30 }
 0x131   :  { %4987 = vmatprep.subr.bf16.mxu1 %v7573_v19  ;;  %v293_v10 = vadd.f32 %v3684_v8, %v3649_v26  ;;  %v7375_v8 = vand.u32 4294901760, %v6630_v54  ;;  %v6644_v26 = vld [vmem:[#allocation5 + $0x300] sm:$0xff] }
 0x133   :  { %4965 = vmatpush3.bf16.msra.mxu0 %v4964_v42  ;;  %v7576_v42 = vand.u32 4294901760, %v6239_v46  ;;  %v7374_v46 = vand.u32 4294901760, %v6632_v51 }
 0x134   :  { %4989 = vmatpush3.bf16.msra.mxu1 %v6406_v60  ;;  %4967 = vmatprep.subr.bf16.mxu0 %v4966_v48 }
 0x135   :  { %4991 = vmatprep.subr.bf16.mxu1 %v6420_v44  ;;  %v5004_v48 = vpack.c.bf16 %v7577_v32, %v7576_v42  ;;  %v5008_v32 = vpack.c.bf16 %v7581_v38, %v7580_v36  ;;  %v6674_v12 = vsub.f32 %v6632_v51, %v7374_v46  ;;  %v6676_v42 = vld [vmem:[#allocation5 + $0x390] sm:$0xff]  ;;  %v7587_v36 = vand.u32 4294901760, %v6332_v24 }
 0x136   :  { %v3717_v30 = vpop.f32.mrb[0].mxu1  ;;  %v7588_v38 = vand.u32 4294901760, %v6335_v43  ;;  %v7589_v24 = vand.u32 4294901760, %v6355_v53  ;;  %v7590_v43 = vand.u32 4294901760, %v6362_v45  ;;  %v7593_v46 = vand.u32 4294901760, %v6514_v11 }
 0x137   :  { %v3718_v20 = vpop.f32.mrb[1].mxu1  ;;  %4969 = vmatpush3.bf16.msra.mxu0 %v4968_v18  ;;  %v6648_v18 = vld [vmem:[#allocation5 + $0x308] sm:$0xff]  ;;  %v7596_v53 = vand.u32 4294901760, %v7567_v41  ;;  %v7597_v45 = vand.u32 4294901760, %v7568_v5 }
 0x138   :  { %v3719_v15 = vadd.f32 %v3718_v20, %v3717_v30  ;;  %4993 = vmatpush3.bf16.msra.mxu1 %v6437_v56  ;;  %5003 = vmatprep.subr.bf16.mxu0 %v5002_v14  ;;  %v7373_v14 = vand.u32 4294901760, %v6644_v26  ;;  %v7583_v30 = vand.u32 4294901760, %v6301_v52  ;;  %v6667_v20 = vsub.f32 %v6630_v54, %v7375_v8  ;;  %v6678_v52 = vld [vmem:[#allocation5 + $0x398] sm:$0xff]  ;;  %v166_v41 = vld [vmem:[#allocation5 + $0x3a8] sm:$0xff] }
 0x139   :  { %4995 = vmatprep.subr.bf16.mxu1 %v6462_v22  ;;  %v7372_v0 = vand.u32 4294901760, %v6648_v18  ;;  %v7595_v8 = vand.u32 4294901760, %v6418_v9 }
 0x13a   :  { %v6650_v4 = vadd.f32 %v3719_v15, %v293_v10  ;;  %2385 = vmatmul.mubr.f32.vlgmr.msra.gmra.mrb[14].mxu0 %v6514_v11  ;;  %v7584_v15 = vand.u32 4294901760, %v6310_v16  ;;  %v7585_v16 = vand.u32 4294901760, %v6316_v35  ;;  %v6687_v33 = vsub.f32 %v6644_v26, %v7373_v14 }
 0x13b   :  { %5005 = vmatpush3.bf16.msra.mxu0 %v5004_v48  ;;  %2659 = vmatprep.mubr.f32.mxu0 %v7582_v58  ;;  %v7586_v48 = vand.u32 4294901760, %v6325_v29  ;;  %v6697_v35 = vsub.f32 %v6648_v18, %v7372_v0  ;;  %v2825_v29 = vand.u32 4294901760, %v6676_v42 }
 0x13c   :  { %4997 = vmatpush3.bf16.msra.mxu1 %v6541_v40  ;;  %5007 = vmatprep.subr.bf16.mxu0 %v5006_v27  ;;  %v5010_v10 = vpack.c.bf16 %v7584_v15, %v7583_v30  ;;  %v147_v27 = vld [vmem:[#allocation5 + $0x310] sm:$0xff]  ;;  %v5014_v30 = vpack.c.bf16 %v7588_v38, %v7587_v36  ;;  %v2828_v15 = vand.u32 4294901760, %v6678_v52  ;;  %v7591_v36 = vand.u32 4294901760, %v6379_v47 }
 0x13d   :  { %4999 = vmatprep.subr.bf16.mxu1 %v6543_v62  ;;  %v5012_v57 = vpack.c.bf16 %v7586_v48, %v7585_v16  ;;  %v148_v16 = vld [vmem:[#allocation5 + $0x318] sm:$0xff]  ;;  %v5016_v48 = vpack.c.bf16 %v7590_v43, %v7589_v24  ;;  %v7592_v38 = vand.u32 4294901760, %v6390_v3  ;;  %v2777_v14 = vand.u32 4294901760, %v147_v27 }
 0x13e   :  { %v5022_v24 = vpack.c.bf16 %v7597_v45, %v7596_v53  ;;  %v7598_v47 = vand.u32 4294901760, %v6432_v28  ;;  %v7599_v3 = vand.u32 4294901760, %v6444_v34  ;;  %v7385_v11 = vand.u32 4294901760, %v6687_v33  ;;  %v48_v34 = vld [vmem:[#allocation2 + $0x38] sm:$0xff] }
 0x13f   :  { %5009 = vmatpush3.bf16.msra.mxu0 %v5008_v32  ;;  %v7386_v32 = vand.u32 4294901760, %v6667_v20  ;;  %v5018_v0 = vpack.c.bf16 %v7592_v38, %v7591_v36  ;;  %v2780_v9 = vand.u32 4294901760, %v148_v16  ;;  %v7376_v28 = vand.u32 4294901760, %v6697_v35 }
 0x140   :  { %5001 = vmatpush3.bf16.msra.mxu1 %v6566_v55  ;;  %5011 = vmatprep.subr.bf16.mxu0 %v5010_v10  ;;  %v6726_v43 = vpack.c.bf16 %v7599_v3, %v7598_v47  ;;  %v7603_v38 = vand.u32 4294901760, %v6497_v49  ;;  %v6769_v47 = vsub.f32 %v147_v27, %v2777_v14  ;;  %v149_v3 = vld [vmem:[#allocation5 + $0x320] sm:$0xff]  ;;  %v150_v49 = vld [vmem:[#allocation5 + $0x328] sm:$0xff] }
 0x141   :  { %5035 = vmatprep.subr.bf16.mxu1 %v6268_v2  ;;  %v7594_v2 = vand.u32 4294901760, %v6396_v21  ;;  %v6731_v21 = vsub.f32 %v6676_v42, %v2825_v29  ;;  %v2998_v5 = vsub.f32 %v6667_v20, %v7386_v32  ;;  %v6745_v42 = vsub.f32 %v6678_v52, %v2828_v15 }
 0x142   :  { %v7607_v52 = vand.u32 4294901760, %v6526_v17  ;;  %v6777_v17 = vsub.f32 %v148_v16, %v2780_v9  ;;  %v2893_v27 = vsub.f32 %v6697_v35, %v7376_v28  ;;  %v7613_v16 = vand.u32 4294901760, %v6644_v26  ;;  %v167_v28 = vld [vmem:[#allocation5 + $0x3b0] sm:$0xff] }
 0x143   :  { %2493 = vmatmul.mubr.f32.vlgmr.msra.gmra.mrb[14].mxu1 %v7593_v46  ;;  %5013 = vmatpush3.bf16.msra.mxu0 %v5012_v57  ;;  %v5020_v10 = vpack.c.bf16 %v7595_v8, %v7594_v2  ;;  %v165_v8 = vld [vmem:[#allocation5 + $0x3a0] sm:$0xff]  ;;  %v7600_v46 = vand.u32 4294901760, %v6464_v31  ;;  %v7604_v2 = vand.u32 4294901760, %v6500_v39  ;;  %v7605_v31 = vand.u32 4294901760, %v6506_v23 }
 0x144   :  { %5037 = vmatpush3.bf16.msra.mxu1 %v7563_v63  ;;  %5015 = vmatprep.subr.bf16.mxu0 %v5014_v30  ;;  %v7601_v63 = vand.u32 4294901760, %v6466_v6  ;;  %v7602_v30 = vand.u32 4294901760, %v6674_v12  ;;  %v7606_v6 = vand.u32 4294901760, %v6509_v13  ;;  %v2831_v39 = vand.u32 4294901760, %v165_v8 }
 0x145   :  { %5039 = vmatprep.subr.bf16.mxu1 %v7564_v25  ;;  %2763 = vmatprep.mubr.f32.mxu1 %v7582_v58  ;;  %v6755_v25 = vpack.c.bf16 %v7604_v2, %v7603_v38  ;;  %v7608_v58 = vand.u32 4294901760, %v6529_v1  ;;  %v2886_v23 = vsub.f32 %v6687_v33, %v7385_v11  ;;  %v6774_v13 = vand.u32 4294901760, %v48_v34 }
 0x146   :  { %v6742_v57 = vpack.c.bf16 %v7601_v63, %v7600_v46  ;;  %v3005_v36 = vsub.f32 %v6674_v12, %v7602_v30  ;;  %v6761_v53 = vpack.c.bf16 %v7606_v6, %v7605_v31  ;;  %v2834_v46 = vand.u32 4294901760, %v166_v41 }
 0x147   :  { %v6767_v45 = vpack.c.bf16 %v7608_v58, %v7607_v52  ;;  %5017 = vmatpush3.bf16.msra.mxu0 %v5016_v48  ;;  %7609 = vst [vmem:[#allocation11_spill] sm:$0xff] %v6774_v13  ;;  %v2999_v1 = vand.u32 4294901760, %v2998_v5  ;;  %v7380_v48 = vand.u32 4294901760, %v6731_v21  ;;  %v2783_v30 = vand.u32 4294901760, %v149_v3 }
 0x148   :  { %5041 = vmatpush3.bf16.msra.mxu1 %v7566_v50  ;;  %5019 = vmatprep.subr.bf16.mxu0 %v5018_v0  ;;  %v3006_v63 = vand.u32 4294901760, %v3005_v36  ;;  %v2786_v38 = vand.u32 4294901760, %v150_v49  ;;  %v7377_v2 = vand.u32 4294901760, %v6745_v42  ;;  %v7610_v31 = vand.u32 4294901760, %v6630_v54 }
 0x149   :  { %5043 = vmatprep.subr.bf16.mxu1 %v7569_v7  ;;  %v7611_v50 = vand.u32 4294901760, %v6632_v51  ;;  %v7614_v5 = vand.u32 4294901760, %v6648_v18  ;;  %v6797_v52 = vpack.c.bf16 %v2828_v15, %v2825_v29  ;;  %v6799_v7 = vpack.c.bf16 %v2780_v9, %v2777_v14  ;;  %v168_v51 = vld [vmem:[#allocation5 + $0x3b8] sm:$0xff]  ;;  %v151_v14 = vld [vmem:[#allocation5 + $0x330] sm:$0xff] }
 0x14a   :  { %v6801_v36 = vpack.c.bf16 %v2834_v46, %v2831_v39  ;;  %v6803_v58 = vsub.f32 %v165_v8, %v2831_v39  ;;  %v2887_v54 = vand.u32 4294901760, %v2886_v23  ;;  %v2894_v26 = vand.u32 4294901760, %v2893_v27  ;;  %v152_v29 = vld [vmem:[#allocation5 + $0x338] sm:$0xff] }
 0x14b   :  { %v6789_v0 = vpack.c.bf16 %v7611_v50, %v7610_v31  ;;  %v6795_v6 = vpack.c.bf16 %v7614_v5, %v7613_v16  ;;  %7616 = vst [vmem:[#allocation19_spill] sm:$0xff] %v6797_v52  ;;  %5021 = vmatpush3.bf16.msra.mxu0 %v5020_v10  ;;  %v6806_v31 = vsub.f32 %v48_v34, %v6774_v13  ;;  %v7379_v15 = vand.u32 4294901760, %v6769_v47 }
 0x14c   :  { %7617 = vst [vmem:[#allocation20_spill] sm:$0xff] %v6801_v36  ;;  %5045 = vmatpush3.bf16.msra.mxu1 %v7570_v59  ;;  %5023 = vmatprep.subr.bf16.mxu0 %v5022_v24  ;;  %v3012_v18 = vsub.f32 %v6731_v21, %v7380_v48  ;;  %v7378_v10 = vand.u32 4294901760, %v6777_v17  ;;  %v6815_v8 = vsub.f32 %v166_v41, %v2834_v46  ;;  %v2837_v50 = vand.u32 4294901760, %v167_v28  ;;  %v169_v46 = vld [vmem:[#allocation5 + $0x3c0] sm:$0xff] }
 0x14d   :  { %7612 = vst [vmem:[#allocation16_spill] sm:$0xff] %v6789_v0  ;;  %7615 = vst [vmem:[#allocation21_spill] sm:$0xff] %v6795_v6  ;;  %v3752_v9 = vpop.f32.mrb[2].mxu0  ;;  %5047 = vmatprep.subr.bf16.mxu1 %v7571_v61  ;;  %v6817_v34 = vpack.c.bf16 %v3006_v63, %v2999_v1  ;;  %v6819_v59 = vpack.c.bf16 %v2786_v38, %v2783_v30  ;;  %v3019_v24 = vsub.f32 %v6745_v42, %v7377_v2  ;;  %v170_v1 = vld [vmem:[#allocation5 + $0x3c8] sm:$0xff] }
 0x14e   :  { %v3753_v39 = vpop.f32.mrb[3].mxu0  ;;  %v6824_v23 = vsub.f32 %v149_v3, %v2783_v30  ;;  %v6826_v27 = vsub.f32 %v150_v49, %v2786_v38  ;;  %v2840_v16 = vand.u32 4294901760, %v168_v51  ;;  %v2789_v61 = vand.u32 4294901760, %v151_v14 }
 0x14f   :  { %7618 = vst [vmem:[#allocation22_spill] sm:$0xff] %v6819_v59  ;;  %v3754_v5 = vadd.f32 %v3753_v39, %v3752_v9  ;;  %5025 = vmatpush3.bf16.msra.mxu0 %v6726_v43  ;;  %v2792_v41 = vand.u32 4294901760, %v152_v29  ;;  %v7387_v63 = vand.u32 4294901760, %v6806_v31  ;;  %v6832_v2 = vpack.c.bf16 %v2894_v26, %v2887_v54 }
 0x150   :  { %5049 = vmatpush3.bf16.msra.mxu1 %v7572_v37  ;;  %5027 = vmatprep.subr.bf16.mxu0 %v6742_v57  ;;  %v3013_v3 = vand.u32 4294901760, %v3012_v18  ;;  %v2900_v49 = vsub.f32 %v6769_v47, %v7379_v15  ;;  %v2907_v43 = vsub.f32 %v6777_v17, %v7378_v10  ;;  %v3020_v38 = vand.u32 4294901760, %v3019_v24 }
 0x151   :  { %v663_v30 = vadd.f32 %v3754_v5, %v6650_v4  ;;  %5051 = vmatprep.subr.bf16.mxu1 %v7573_v19  ;;  %v7383_v37 = vand.u32 4294901760, %v6803_v58  ;;  %v7381_v57 = vand.u32 4294901760, %v6815_v8  ;;  %v6844_v54 = vpack.c.bf16 %v2840_v16, %v2837_v50  ;;  %v6852_v4 = vld [vmem:[#allocation5 + $0x340] sm:$0xff] }
 0x152   :  { %v2843_v26 = vand.u32 4294901760, %v169_v46  ;;  %v2846_v18 = vand.u32 4294901760, %v170_v1  ;;  %v7382_v9 = vand.u32 4294901760, %v6824_v23  ;;  %v6848_v39 = vsub.f32 %v167_v28, %v2837_v50 }
 0x153   :  { %7619 = vst [vmem:[#allocation14_spill] sm:$0xff] %v6844_v54  ;;  %5029 = vmatpush3.bf16.msra.mxu0 %v6755_v25  ;;  %v6850_v10 = vsub.f32 %v168_v51, %v2840_v16  ;;  %v7384_v19 = vand.u32 4294901760, %v6826_v27  ;;  %v2869_v24 = vsub.f32 %v6806_v31, %v7387_v63  ;;  %v6860_v5 = vpack.c.bf16 %v2792_v41, %v2789_v61 }
 0x154   :  { %5053 = vmatpush3.bf16.msra.mxu1 %v6406_v60  ;;  %5031 = vmatprep.subr.bf16.mxu0 %v6761_v53  ;;  %v6862_v15 = vsub.f32 %v151_v14, %v2789_v61  ;;  %v6864_v28 = vsub.f32 %v152_v29, %v2792_v41  ;;  %v2901_v25 = vand.u32 4294901760, %v2900_v49  ;;  %v6867_v51 = vpack.c.bf16 %v3020_v38, %v3013_v3  ;;  %v154_v29 = vld [vmem:[#allocation5 + $0x348] sm:$0xff]  ;;  %v171_v49 = vld [vmem:[#allocation5 + $0x3d0] sm:$0xff] }
 0x155   :  { %7620 = vst [vmem:[#allocation15_spill] sm:$0xff] %v6860_v5  ;;  %5055 = vmatprep.subr.bf16.mxu1 %v6420_v44  ;;  %v2908_v50 = vand.u32 4294901760, %v2907_v43  ;;  %v3026_v16 = vsub.f32 %v6803_v58, %v7383_v37  ;;  %v3033_v60 = vsub.f32 %v6815_v8, %v7381_v57  ;;  %v6875_v48 = vpack.c.bf16 %v2846_v18, %v2843_v26  ;;  %v172_v43 = vld [vmem:[#allocation5 + $0x3d8] sm:$0xff] }
 0x156   :  { %7621 = vst [vmem:[#allocation17_spill] sm:$0xff] %v6862_v15  ;;  %7622 = vst [vmem:[#allocation18_spill] sm:$0xff] %v6864_v28  ;;  %v3787_v53 = vpop.f32.mrb[2].mxu1  ;;  %v6877_v14 = vsub.f32 %v169_v46, %v2843_v26  ;;  %v2795_v61 = vand.u32 4294901760, %v6852_v4  ;;  %v2914_v44 = vsub.f32 %v6824_v23, %v7382_v9  ;;  %v2921_v3 = vsub.f32 %v6826_v27, %v7384_v19  ;;  %v155_v46 = vld [vmem:[#allocation5 + $0x350] sm:$0xff] }
 0x157   :  { %7623 = vst [vmem:[#allocation12_spill] sm:$0xff] %v6875_v48  ;;  %v3788_v41 = vpop.f32.mrb[3].mxu1  ;;  %5033 = vmatpush3.bf16.msra.mxu0 %v6767_v45  ;;  %v7388_v38 = vand.u32 4294901760, %v6848_v39  ;;  %v2870_v26 = vand.u32 4294901760, %v2869_v24  ;;  %v6891_v9 = vsub.f32 %v170_v1, %v2846_v18  ;;  %v7395_v45 = vand.u32 4294901760, %v6862_v15  ;;  %v156_v24 = vld [vmem:[#allocation5 + $0x358] sm:$0xff] }
 0x158   :  { %v3789_v57 = vadd.f32 %v3788_v41, %v3787_v53  ;;  %5057 = vmatpush3.bf16.msra.mxu1 %v6437_v56  ;;  %5067 = vmatprep.subr.bf16.mxu0 %v6789_v0  ;;  %v6896_v19 = vpack.c.bf16 %v2908_v50, %v2901_v25  ;;  %v3027_v11 = vand.u32 4294901760, %v3026_v16  ;;  %v3034_v32 = vand.u32 4294901760, %v3033_v60  ;;  %v7624_v56 = vld [vmem:[#allocation13_spill] sm:$0xff] }
 0x159   :  { %5059 = vmatprep.subr.bf16.mxu1 %v6462_v22  ;;  %v2798_v63 = vand.u32 4294901760, %v154_v29  ;;  %v6902_v1 = vsub.f32 %v6852_v4, %v2795_v61  ;;  %v2849_v18 = vand.u32 4294901760, %v171_v49  ;;  %v2852_v41 = vand.u32 4294901760, %v172_v43 }
 0x15a   :  { %v6898_v53 = vadd.f32 %v3789_v57, %v663_v30  ;;  %2661 = vmatmul.mubr.f32.vlgmr.msra.gmra.mrb[16].mxu0 %v7624_v56  ;;  %v2915_v37 = vand.u32 4294901760, %v2914_v44  ;;  %v2922_v22 = vand.u32 4294901760, %v2921_v3  ;;  %v3040_v25 = vsub.f32 %v6848_v39, %v7388_v38  ;;  %v173_v57 = vld [vmem:[#allocation5 + $0x3e0] sm:$0xff]  ;;  %v174_v38 = vld [vmem:[#allocation5 + $0x3e8] sm:$0xff] }
 0x15b   :  { %5069 = vmatpush3.bf16.msra.mxu0 %v6795_v6  ;;  %v7625_v50 = vand.u32 4294901760, %v6850_v10  ;;  %2871 = vmatprep.mubr.f32.mxu0 %v2870_v26  ;;  %v2801_v4 = vand.u32 4294901760, %v155_v46  ;;  %v2804_v16 = vand.u32 4294901760, %v156_v24  ;;  %v2928_v60 = vsub.f32 %v6862_v15, %v7395_v45 }
 0x15c   :  { %5061 = vmatpush3.bf16.msra.mxu1 %v6541_v40  ;;  %5071 = vmatprep.subr.bf16.mxu0 %v6797_v52  ;;  %v7626_v44 = vand.u32 4294901760, %v6864_v28  ;;  %v6922_v26 = vpack.c.bf16 %v2798_v63, %v2795_v61  ;;  %v6924_v40 = vsub.f32 %v154_v29, %v2798_v63  ;;  %v7400_v52 = vand.u32 4294901760, %v6877_v14 }
 0x15d   :  { %v3047_v30 = vsub.f32 %v6850_v10, %v7625_v50  ;;  %5063 = vmatprep.subr.bf16.mxu1 %v6543_v62  ;;  %v6920_v50 = vpack.c.bf16 %v3034_v32, %v3027_v11  ;;  %v6927_v6 = vpack.c.bf16 %v2852_v41, %v2849_v18  ;;  %v6929_v0 = vsub.f32 %v171_v49, %v2849_v18 }
 0x15e   :  { %v2935_v3 = vsub.f32 %v6864_v28, %v7626_v44  ;;  %7627 = vst [vmem:[#allocation13_spill] sm:$0xff] %v6922_v26  ;;  %v6931_v45 = vsub.f32 %v172_v43, %v2852_v41  ;;  %v2855_v15 = vand.u32 4294901760, %v173_v57  ;;  %v3041_v44 = vand.u32 4294901760, %v3040_v25  ;;  %v158_v41 = vld [vmem:[#allocation5 + $0x368] sm:$0xff] }
 0x15f   :  { %7628 = vst [vmem:[#allocation23_spill] sm:$0xff] %v6927_v6  ;;  %5073 = vmatpush3.bf16.msra.mxu0 %v6799_v7  ;;  %v3048_v28 = vand.u32 4294901760, %v3047_v30  ;;  %v2858_v62 = vand.u32 4294901760, %v174_v38  ;;  %v7401_v32 = vand.u32 4294901760, %v6891_v9  ;;  %v6937_v11 = vpack.c.bf16 %v2922_v22, %v2915_v37  ;;  %v6955_v30 = vld [vmem:[#allocation5 + $0x3f0] sm:$0xff] }
 0x160   :  { %5065 = vmatpush3.bf16.msra.mxu1 %v6566_v55  ;;  %5075 = vmatprep.subr.bf16.mxu0 %v6801_v36  ;;  %v6939_v63 = vpack.c.bf16 %v2804_v16, %v2801_v4  ;;  %v2929_v29 = vand.u32 4294901760, %v2928_v60  ;;  %v2936_v61 = vand.u32 4294901760, %v2935_v3  ;;  %v6942_v49 = vsub.f32 %v155_v46, %v2801_v4  ;;  %v157_v55 = vld [vmem:[#allocation5 + $0x360] sm:$0xff]  ;;  %v47_v60 = vld [vmem:[#allocation2 + $0x30] sm:$0xff] }
 0x161   :  { %5099 = vmatprep.subr.bf16.mxu1 %v6817_v34  ;;  %v6944_v43 = vsub.f32 %v156_v24, %v2804_v16  ;;  %v6949_v18 = vsub.f32 %v6877_v14, %v7400_v52  ;;  %v7402_v37 = vand.u32 4294901760, %v6902_v1  ;;  %v6952_v22 = vsub.f32 %v173_v57, %v2855_v15  ;;  %v6957_v34 = vld [vmem:[#allocation5 + $0x3f8] sm:$0xff] }
 0x162   :  { %v7409_v25 = vand.u32 4294901760, %v6924_v40  ;;  %v5110_v4 = vpack.c.bf16 %v3048_v28, %v3041_v44  ;;  %v6963_v16 = vpack.c.bf16 %v2858_v62, %v2855_v15  ;;  %v3061_v57 = vsub.f32 %v6891_v9, %v7401_v32  ;;  %v6981_v32 = vld [vmem:[#allocation5 + $0x378] sm:$0xff] }
 0x163   :  { %7629 = vst [vmem:[#allocation24_spill] sm:$0xff] %v6944_v43  ;;  %7630 = vst [vmem:[#allocation25_spill] sm:$0xff] %v6952_v22  ;;  %2765 = vmatmul.mubr.f32.vlgmr.msra.gmra.mrb[16].mxu1 %v7624_v56  ;;  %5077 = vmatpush3.bf16.msra.mxu0 %v6819_v59  ;;  %v5112_v3 = vpack.c.bf16 %v2936_v61, %v2929_v29  ;;  %v6970_v52 = vsub.f32 %v174_v38, %v2858_v62  ;;  %v2807_v24 = vand.u32 4294901760, %v157_v55 }
 0x164   :  { %5101 = vmatpush3.bf16.msra.mxu1 %v6832_v2  ;;  %5079 = vmatprep.subr.bf16.mxu0 %v6844_v54  ;;  %v2810_v46 = vand.u32 4294901760, %v158_v41  ;;  %v3055_v28 = vand.u32 4294901760, %v6949_v18  ;;  %v2942_v15 = vsub.f32 %v6902_v1, %v7402_v37  ;;  %v2861_v56 = vand.u32 4294901760, %v6955_v30  ;;  %v6979_v2 = vld [vmem:[#allocation5 + $0x370] sm:$0xff] }
 0x165   :  { %5103 = vmatprep.subr.bf16.mxu1 %v6867_v51  ;;  %v2864_v44 = vand.u32 4294901760, %v6957_v34  ;;  %3107 = vmatprep.mubr.f32.mxu1 %v6774_v13  ;;  %v2949_v51 = vsub.f32 %v6924_v40, %v7409_v25  ;;  %v7631_v38 = vand.u32 4294901760, %v6929_v0  ;;  %v7632_v29 = vand.u32 4294901760, %v6931_v45 }
 0x166   :  { %v6993_v18 = vand.u32 4294901760, %v47_v60  ;;  %v3062_v37 = vand.u32 4294901760, %v3061_v57  ;;  %v7003_v25 = vsub.f32 %v158_v41, %v2810_v46  ;;  %v2816_v36 = vand.u32 4294901760, %v6981_v32 }
 0x167   :  { %v3068_v62 = vsub.f32 %v6929_v0, %v7631_v38  ;;  %v3075_v61 = vsub.f32 %v6931_v45, %v7632_v29  ;;  %5081 = vmatpush3.bf16.msra.mxu0 %v6860_v5  ;;  %v7001_v38 = vsub.f32 %v157_v55, %v2807_v24  ;;  %v2813_v29 = vand.u32 4294901760, %v6979_v2 }
 0x168   :  { %5105 = vmatpush3.bf16.msra.mxu1 %v6896_v19  ;;  %5083 = vmatprep.subr.bf16.mxu0 %v6875_v48  ;;  %v2943_v57 = vand.u32 4294901760, %v2942_v15  ;;  %v7009_v54 = vsub.f32 %v6955_v30, %v2861_v56  ;;  %v7012_v59 = vsub.f32 %v6957_v34, %v2864_v44  ;;  %v2950_v13 = vand.u32 4294901760, %v2949_v51 }
 0x169   :  { %5107 = vmatprep.subr.bf16.mxu1 %v6920_v50  ;;  %v3069_v55 = vand.u32 4294901760, %v3068_v62  ;;  %v3076_v48 = vand.u32 4294901760, %v3075_v61  ;;  %v7016_v41 = vsub.f32 %v47_v60, %v6993_v18  ;;  %v7019_v5 = vpack.c.bf16 %v2810_v46, %v2807_v24 }
 0x16a   :  { %v7633_v50 = vand.u32 4294901760, %v6942_v49  ;;  %v7634_v15 = vand.u32 4294901760, %v6944_v43  ;;  %v7635_v19 = vand.u32 4294901760, %v6952_v22  ;;  %v7033_v60 = vsub.f32 %v6979_v2, %v2813_v29 }
 0x16b   :  { %5085 = vmatpush3.bf16.msra.mxu0 %v6922_v26  ;;  %v7036_v46 = vsub.f32 %v6981_v32, %v2816_v36  ;;  %v2976_v62 = vand.u32 4294901760, %v7003_v25  ;;  %v5116_v26 = vpack.c.bf16 %v2950_v13, %v2943_v57  ;;  %v5118_v32 = vpack.c.bf16 %v3076_v48, %v3069_v55 }
 0x16c   :  { %v2956_v30 = vsub.f32 %v6942_v49, %v7633_v50  ;;  %v2963_v34 = vsub.f32 %v6944_v43, %v7634_v15  ;;  %v3082_v51 = vsub.f32 %v6952_v22, %v7635_v19  ;;  %5109 = vmatpush3.bf16.msra.mxu1 %v6937_v11  ;;  %5087 = vmatprep.subr.bf16.mxu0 %v6927_v6  ;;  %v7636_v15 = vand.u32 4294901760, %v6970_v52 }
 0x16d   :  { %v3822_v61 = vpop.f32.mrb[4].mxu0  ;;  %5111 = vmatprep.subr.bf16.mxu1 %v5110_v4  ;;  %v5114_v50 = vpack.c.bf16 %v3062_v37, %v3055_v28  ;;  %v7426_v11 = vand.u32 4294901760, %v7009_v54  ;;  %v7045_v22 = vpack.c.bf16 %v2864_v44, %v2861_v56  ;;  %v2874_v24 = vand.u32 4294901760, %v7016_v41 }
 0x16e   :  { %v3089_v19 = vsub.f32 %v6970_v52, %v7636_v15  ;;  %v3823_v2 = vpop.f32.mrb[5].mxu0  ;;  %v2957_v4 = vand.u32 4294901760, %v2956_v30  ;;  %v2964_v37 = vand.u32 4294901760, %v2963_v34  ;;  %v3083_v28 = vand.u32 4294901760, %v3082_v51 }
 0x16f   :  { %v3824_v43 = vadd.f32 %v3823_v2, %v3822_v61  ;;  %5089 = vmatpush3.bf16.msra.mxu0 %v6939_v63  ;;  %v7637_v15 = vand.u32 4294901760, %v7001_v38  ;;  %v2977_v13 = vsub.f32 %v7003_v25, %v2976_v62  ;;  %v7424_v48 = vand.u32 4294901760, %v7033_v60 }
 0x170   :  { %5113 = vmatpush3.bf16.msra.mxu1 %v5112_v3  ;;  %5091 = vmatprep.subr.bf16.mxu0 %v6963_v16  ;;  %v7425_v56 = vand.u32 4294901760, %v7036_v46  ;;  %v3090_v57 = vand.u32 4294901760, %v3089_v19  ;;  %v3096_v3 = vsub.f32 %v7009_v54, %v7426_v11  ;;  %v7638_v55 = vand.u32 4294901760, %v7012_v59 }
 0x171   :  { %v2970_v6 = vsub.f32 %v7001_v38, %v7637_v15  ;;  %v939_v44 = vadd.f32 %v3824_v43, %v6898_v53  ;;  %5115 = vmatprep.subr.bf16.mxu1 %v5114_v50  ;;  %v2875_v34 = vsub.f32 %v7016_v41, %v2874_v24  ;;  %v7069_v51 = vpack.c.bf16 %v2816_v36, %v2813_v29 }
 0x172   :  { %v3103_v30 = vsub.f32 %v7012_v59, %v7638_v55  ;;  %v5120_v61 = vpack.c.bf16 %v2964_v37, %v2957_v4  ;;  %v5130_v53 = vpack.c.bf16 %v6674_v12, %v6667_v20  ;;  %v2978_v50 = vand.u32 4294901760, %v2977_v13 }
 0x173   :  { %5093 = vmatpush3.bf16.msra.mxu0 %v7019_v5  ;;  %v2971_v43 = vand.u32 4294901760, %v2970_v6  ;;  %v2984_v19 = vsub.f32 %v7033_v60, %v7424_v48  ;;  %v2991_v2 = vsub.f32 %v7036_v46, %v7425_v56  ;;  %v5122_v36 = vpack.c.bf16 %v3090_v57, %v3083_v28 }
 0x174   :  { %5117 = vmatpush3.bf16.msra.mxu1 %v5116_v26  ;;  %5095 = vmatprep.subr.bf16.mxu0 %v7045_v22  ;;  %v3097_v29 = vand.u32 4294901760, %v3096_v3  ;;  %v3104_v4 = vand.u32 4294901760, %v3103_v30  ;;  %v2876_v15 = vand.u32 4294901760, %v2875_v34  ;;  %v5132_v6 = vpack.c.bf16 %v6697_v35, %v6687_v33 }
 0x175   :  { %5119 = vmatprep.subr.bf16.mxu1 %v5118_v32  ;;  %v5134_v26 = vpack.c.bf16 %v6745_v42, %v6731_v21  ;;  %v5124_v48 = vpack.c.bf16 %v2978_v50, %v2971_v43  ;;  %v2985_v56 = vand.u32 4294901760, %v2984_v19  ;;  %v2992_v32 = vand.u32 4294901760, %v2991_v2  ;;  %v7642_v50 = vld [vmem:[#allocation21_spill] sm:$0xff]  ;;  %v7643_v2 = vld [vmem:[#allocation19_spill] sm:$0xff] }
 0x176   :  { %v3857_v37 = vpop.f32.mrb[4].mxu1  ;;  %v5126_v28 = vpack.c.bf16 %v3104_v4, %v3097_v29  ;;  %v5136_v3 = vpack.c.bf16 %v6777_v17, %v6769_v47  ;;  %v5138_v34 = vpack.c.bf16 %v6815_v8, %v6803_v58  ;;  %v5146_v19 = vpack.c.bf16 %v6891_v9, %v6877_v14 }
 0x177   :  { %v3858_v55 = vpop.f32.mrb[5].mxu1  ;;  %5097 = vmatpush3.bf16.msra.mxu0 %v7069_v51  ;;  %v5128_v30 = vpack.c.bf16 %v2992_v32, %v2985_v56  ;;  %v7641_v56 = vld [vmem:[#allocation18_spill] sm:$0xff]  ;;  %v5148_v29 = vpack.c.bf16 %v6924_v40, %v6902_v1  ;;  %v5150_v4 = vpack.c.bf16 %v6931_v45, %v6929_v0 }
 0x178   :  { %v3859_v13 = vadd.f32 %v3858_v55, %v3857_v37  ;;  %5121 = vmatpush3.bf16.msra.mxu1 %v5120_v61  ;;  %5131 = vmatprep.subr.bf16.mxu0 %v5130_v53  ;;  %v5140_v61 = vpack.c.bf16 %v6826_v27, %v6824_v23  ;;  %v7639_v53 = vld [vmem:[#allocation16_spill] sm:$0xff]  ;;  %v7649_v32 = vld [vmem:[#allocation14_spill] sm:$0xff] }
 0x179   :  { %5123 = vmatprep.subr.bf16.mxu1 %v5122_v36  ;;  %v7644_v36 = vand.u32 4294901760, %v6806_v31  ;;  %v7645_v37 = vld [vmem:[#allocation20_spill] sm:$0xff] }
 0x17a   :  { %v1043_v57 = vadd.f32 %v3859_v13, %v939_v44  ;;  %2877 = vmatmul.mubr.f32.vlgmr.msra.gmra.mrb[18].mxu0 %v2876_v15  ;;  %v5142_v44 = vpack.c.bf16 %v6850_v10, %v6848_v39  ;;  %v7646_v15 = vld [vmem:[#allocation24_spill] sm:$0xff] }
 0x17b   :  { %5133 = vmatpush3.bf16.msra.mxu0 %v5132_v6  ;;  %3244 = vmatprep.mubr.f32.mxu0 %v6806_v31  ;;  %v5152_v55 = vpack.c.bf16 %v7646_v15, %v6942_v49  ;;  %v7647_v6 = vld [vmem:[#allocation22_spill] sm:$0xff]  ;;  %v7648_v31 = vld [vmem:[#allocation25_spill] sm:$0xff] }
 0x17c   :  { %5125 = vmatpush3.bf16.msra.mxu1 %v5124_v48  ;;  %5135 = vmatprep.subr.bf16.mxu0 %v5134_v26  ;;  %v7640_v48 = vld [vmem:[#allocation17_spill] sm:$0xff]  ;;  %v5154_v26 = vpack.c.bf16 %v6970_v52, %v7648_v31 }
 0x17d   :  { %5127 = vmatprep.subr.bf16.mxu1 %v5126_v28  ;;  %v5144_v43 = vpack.c.bf16 %v7641_v56, %v7640_v48 }
 0x17f   :  { %5137 = vmatpush3.bf16.msra.mxu0 %v5136_v3 }
 0x180   :  { %5129 = vmatpush3.bf16.msra.mxu1 %v5128_v30  ;;  %5139 = vmatprep.subr.bf16.mxu0 %v5138_v34  ;;  %v5156_v30 = vpack.c.bf16 %v7003_v25, %v7001_v38  ;;  %v7650_v34 = vld [vmem:[#allocation15_spill] sm:$0xff] }
 0x181   :  { %5163 = vmatprep.subr.bf16.mxu1 %v7639_v53 }
 0x183   :  { %3109 = vmatmul.mubr.f32.vlgmr.msra.gmra.mrb[18].mxu1 %v6993_v18  ;;  %5141 = vmatpush3.bf16.msra.mxu0 %v5140_v61  ;;  %v5158_v61 = vpack.c.bf16 %v7012_v59, %v7009_v54 }
 0x184   :  { %5165 = vmatpush3.bf16.msra.mxu1 %v7642_v50  ;;  %5143 = vmatprep.subr.bf16.mxu0 %v5142_v44 }
 0x185   :  { %5167 = vmatprep.subr.bf16.mxu1 %v7643_v2  ;;  %3351 = vmatprep.mubr.f32.mxu1 %v7644_v36  ;;  %v7652_v36 = vld [vmem:[#allocation13_spill] sm:$0xff] }
 0x187   :  { %5145 = vmatpush3.bf16.msra.mxu0 %v5144_v43  ;;  %v7651_v43 = vld [vmem:[#allocation12_spill] sm:$0xff] }
 0x188   :  { %5169 = vmatpush3.bf16.msra.mxu1 %v6799_v7  ;;  %5147 = vmatprep.subr.bf16.mxu0 %v5146_v19  ;;  %v5160_v19 = vpack.c.bf16 %v7036_v46, %v7033_v60 }
 0x189   :  { %5171 = vmatprep.subr.bf16.mxu1 %v7645_v37 }
 0x18b   :  { %5149 = vmatpush3.bf16.msra.mxu0 %v5148_v29  ;;  %v7653_v29 = vand.u32 4294901760, %v6667_v20  ;;  %v7659_v20 = vand.u32 4294901760, %v6745_v42  ;;  %v7664_v42 = vand.u32 4294901760, %v6815_v8  ;;  %v7670_v8 = vand.u32 4294901760, %v7641_v56 }
 0x18c   :  { %5173 = vmatpush3.bf16.msra.mxu1 %v7647_v6  ;;  %5151 = vmatprep.subr.bf16.mxu0 %v5150_v4  ;;  %v7654_v4 = vand.u32 4294901760, %v6674_v12 }
 0x18d   :  { %v3892_v13 = vpop.f32.mrb[6].mxu0  ;;  %5175 = vmatprep.subr.bf16.mxu1 %v7649_v32 }
 0x18e   :  { %v3893_v28 = vpop.f32.mrb[7].mxu0 }
 0x18f   :  { %v3894_v3 = vadd.f32 %v3893_v28, %v3892_v13  ;;  %5153 = vmatpush3.bf16.msra.mxu0 %v5152_v55  ;;  %v5194_v55 = vpack.c.bf16 %v7654_v4, %v7653_v29  ;;  %v7655_v13 = vld [vmem:[#allocation23_spill] sm:$0xff] }
 0x190   :  { %5177 = vmatpush3.bf16.msra.mxu1 %v7650_v34  ;;  %5155 = vmatprep.subr.bf16.mxu0 %v5154_v26  ;;  %v7662_v4 = vld [vmem:[#allocation11_spill] sm:$0xff] }
 0x191   :  { %v1155_v44 = vadd.f32 %v3894_v3, %v1043_v57  ;;  %5179 = vmatprep.subr.bf16.mxu1 %v7651_v43  ;;  %v7656_v57 = vand.u32 4294901760, %v6687_v33  ;;  %v7657_v3 = vand.u32 4294901760, %v6697_v35  ;;  %v7660_v33 = vand.u32 4294901760, %v6769_v47 }
 0x192   :  { %v7661_v35 = vand.u32 4294901760, %v6777_v17  ;;  %v7666_v47 = vand.u32 4294901760, %v6826_v27  ;;  %v7667_v17 = vand.u32 4294901760, %v6848_v39  ;;  %v7671_v27 = vand.u32 4294901760, %v6877_v14 }
 0x193   :  { %5157 = vmatpush3.bf16.msra.mxu0 %v5156_v30  ;;  %v5196_v30 = vpack.c.bf16 %v7657_v3, %v7656_v57  ;;  %v7672_v39 = vand.u32 4294901760, %v6891_v9  ;;  %v7676_v14 = vand.u32 4294901760, %v6931_v45  ;;  %v7677_v9 = vand.u32 4294901760, %v6942_v49 }
 0x194   :  { %5181 = vmatpush3.bf16.msra.mxu1 %v7652_v36  ;;  %5159 = vmatprep.subr.bf16.mxu0 %v5158_v61  ;;  %v7658_v61 = vand.u32 4294901760, %v6731_v21  ;;  %v7663_v21 = vand.u32 4294901760, %v6803_v58  ;;  %v7669_v58 = vand.u32 4294901760, %v7640_v48  ;;  %v7675_v48 = vand.u32 4294901760, %v6929_v0 }
 0x195   :  { %5183 = vmatprep.subr.bf16.mxu1 %v7655_v13  ;;  %v7685_v3 = vand.u32 4294901760, %v7036_v46 }
 0x196   :  { %v3927_v26 = vpop.f32.mrb[6].mxu1  ;;  %v5198_v12 = vpack.c.bf16 %v7659_v20, %v7658_v61  ;;  %v5214_v56 = vpack.c.bf16 %v7676_v14, %v7675_v48 }
 0x197   :  { %v3928_v28 = vpop.f32.mrb[7].mxu1  ;;  %5161 = vmatpush3.bf16.msra.mxu0 %v5160_v19  ;;  %v5200_v19 = vpack.c.bf16 %v7661_v35, %v7660_v33 }
 0x198   :  { %v3929_v11 = vadd.f32 %v3928_v28, %v3927_v26  ;;  %5185 = vmatpush3.bf16.msra.mxu1 %v6939_v63  ;;  %5195 = vmatprep.subr.bf16.mxu0 %v5194_v55  ;;  %v5202_v55 = vpack.c.bf16 %v7664_v42, %v7663_v21  ;;  %v7668_v26 = vand.u32 4294901760, %v6850_v10  ;;  %v5210_v10 = vpack.c.bf16 %v7672_v39, %v7671_v27 }
 0x199   :  { %5187 = vmatprep.subr.bf16.mxu1 %v6963_v16 }
 0x19a   :  { %v1387_v29 = vadd.f32 %v3929_v11, %v1155_v44  ;;  %3247 = vmatmul.mubr.f32.vlgmr.msra.gmra.mrb[20].mxu0 %v7016_v41  ;;  %v7665_v11 = vand.u32 4294901760, %v6824_v23  ;;  %v5206_v28 = vpack.c.bf16 %v7668_v26, %v7667_v17  ;;  %v5208_v23 = vpack.c.bf16 %v7670_v8, %v7669_v58 }
 0x19b   :  { %5197 = vmatpush3.bf16.msra.mxu0 %v5196_v30  ;;  %3521 = vmatprep.mubr.f32.mxu0 %v7662_v4  ;;  %v7673_v41 = vand.u32 4294901760, %v6902_v1  ;;  %v7679_v1 = vand.u32 4294901760, %v7648_v31 }
 0x19c   :  { %5189 = vmatpush3.bf16.msra.mxu1 %v7019_v5  ;;  %5199 = vmatprep.subr.bf16.mxu0 %v5198_v12  ;;  %v5204_v44 = vpack.c.bf16 %v7666_v47, %v7665_v11 }
 0x19d   :  { %5191 = vmatprep.subr.bf16.mxu1 %v7045_v22 }
 0x19f   :  { %5201 = vmatpush3.bf16.msra.mxu0 %v5200_v19 }
 0x1a0   :  { %5193 = vmatpush3.bf16.msra.mxu1 %v7069_v51  ;;  %5203 = vmatprep.subr.bf16.mxu0 %v5202_v55 }
 0x1a1   :  { %5227 = vmatprep.subr.bf16.mxu1 %v7639_v53 }
 0x1a3   :  { %3355 = vmatmul.mubr.f32.vlgmr.msra.gmra.mrb[20].mxu1 %v2874_v24  ;;  %5205 = vmatpush3.bf16.msra.mxu0 %v5204_v44  ;;  %v7674_v24 = vand.u32 4294901760, %v6924_v40 }
 0x1a4   :  { %5229 = vmatpush3.bf16.msra.mxu1 %v7642_v50  ;;  %5207 = vmatprep.subr.bf16.mxu0 %v5206_v28  ;;  %v7678_v50 = vand.u32 4294901760, %v7646_v15  ;;  %v7682_v15 = vand.u32 4294901760, %v7009_v54 }
 0x1a5   :  { %5231 = vmatprep.subr.bf16.mxu1 %v7643_v2  ;;  %3625 = vmatprep.mubr.f32.mxu1 %v7662_v4  ;;  %v5212_v53 = vpack.c.bf16 %v7674_v24, %v7673_v41 }
 0x1a6   :  { %v5216_v2 = vpack.c.bf16 %v7678_v50, %v7677_v9 }
 0x1a7   :  { %5209 = vmatpush3.bf16.msra.mxu0 %v5208_v23 }
 0x1a8   :  { %5233 = vmatpush3.bf16.msra.mxu1 %v6799_v7  ;;  %5211 = vmatprep.subr.bf16.mxu0 %v5210_v10  ;;  %v7680_v7 = vand.u32 4294901760, %v6970_v52 }
 0x1a9   :  { %5235 = vmatprep.subr.bf16.mxu1 %v7645_v37  ;;  %v7681_v37 = vand.u32 4294901760, %v7001_v38 }
 0x1aa   :  { %v5218_v40 = vpack.c.bf16 %v7680_v7, %v7679_v1 }
 0x1ab   :  { %5213 = vmatpush3.bf16.msra.mxu0 %v5212_v53  ;;  %v5220_v49 = vpack.c.bf16 %v2976_v62, %v7681_v37 }
 0x1ac   :  { %5237 = vmatpush3.bf16.msra.mxu1 %v7647_v6  ;;  %5215 = vmatprep.subr.bf16.mxu0 %v5214_v56  ;;  %v7683_v6 = vand.u32 4294901760, %v7012_v59 }
 0x1ad   :  { %v3962_v0 = vpop.f32.mrb[8].mxu0  ;;  %5239 = vmatprep.subr.bf16.mxu1 %v7649_v32  ;;  %v7684_v32 = vand.u32 4294901760, %v7033_v60 }
 0x1ae   :  { %v3963_v45 = vpop.f32.mrb[9].mxu0  ;;  %v5222_v52 = vpack.c.bf16 %v7683_v6, %v7682_v15 }
 0x1af   :  { %v3964_v57 = vadd.f32 %v3963_v45, %v3962_v0  ;;  %5217 = vmatpush3.bf16.msra.mxu0 %v5216_v2  ;;  %v5224_v38 = vpack.c.bf16 %v7685_v3, %v7684_v32 }
 0x1b0   :  { %5241 = vmatpush3.bf16.msra.mxu1 %v7650_v34  ;;  %5219 = vmatprep.subr.bf16.mxu0 %v5218_v40 }
 0x1b1   :  { %v1525_v31 = vadd.f32 %v3964_v57, %v1387_v29  ;;  %5243 = vmatprep.subr.bf16.mxu1 %v7651_v43 }
 0x1b3   :  { %5221 = vmatpush3.bf16.msra.mxu0 %v5220_v49 }
 0x1b4   :  { %5245 = vmatpush3.bf16.msra.mxu1 %v7652_v36  ;;  %5223 = vmatprep.subr.bf16.mxu0 %v5222_v52 }
 0x1b5   :  { %5247 = vmatprep.subr.bf16.mxu1 %v7655_v13 }
 0x1b6   :  { %v3997_v25 = vpop.f32.mrb[8].mxu1 }
 0x1b7   :  { %v3998_v62 = vpop.f32.mrb[9].mxu1  ;;  %5225 = vmatpush3.bf16.msra.mxu0 %v5224_v38 }
 0x1b8   :  { %v3999_v54 = vadd.f32 %v3998_v62, %v3997_v25  ;;  %5249 = vmatpush3.bf16.msra.mxu1 %v6939_v63 }
 0x1b9   :  { %5251 = vmatprep.subr.bf16.mxu1 %v6963_v16 }
 0x1ba   :  { %v1633_v59 = vadd.f32 %v3999_v54, %v1525_v31  ;;  %3523 = vmatmul.mubr.f32.vlgmr.msra.gmra.mrb[22].mxu0 %v6993_v18 }
 0x1bc   :  { %5253 = vmatpush3.bf16.msra.mxu1 %v7019_v5 }
 0x1bd   :  { %5255 = vmatprep.subr.bf16.mxu1 %v7045_v22 }
 0x1c0   :  { %5257 = vmatpush3.bf16.msra.mxu1 %v7069_v51 }
 0x1c3   :  { %3627 = vmatmul.mubr.f32.vlgmr.msra.gmra.mrb[22].mxu1 %v6993_v18 }
 0x1cd   :  { %v4032_v60 = vpop.f32.mrb[10].mxu0 }
 0x1ce   :  { %v4033_v46 = vpop.f32.mrb[11].mxu0 }
 0x1cf   :  { %v4034_v34 = vadd.f32 %v4033_v46, %v4032_v60 }
 0x1d1   :  { %v1801_v43 = vadd.f32 %v4034_v34, %v1633_v59 }
 0x1d6   :  { %v4067_v36 = vpop.f32.mrb[10].mxu1 }
 0x1d7   :  { %v4068_v13 = vpop.f32.mrb[11].mxu1 }
 0x1d8   :  { %v4069_v63 = vadd.f32 %v4068_v13, %v4067_v36 }
 0x1da   :  { %v1905_v30 = vadd.f32 %v4069_v63, %v1801_v43 }
 0x1ed   :  { %v4102_v16 = vpop.f32.mrb[12].mxu0 }
 0x1ee   :  { %v4103_v61 = vpop.f32.mrb[13].mxu0 }
 0x1ef   :  { %v4104_v20 = vadd.f32 %v4103_v61, %v4102_v16 }
 0x1f1   :  { %v2017_v12 = vadd.f32 %v4104_v20, %v1905_v30 }
 0x1f6   :  { %v4137_v29 = vpop.f32.mrb[12].mxu1 }
 0x1f7   :  { %v4138_v5 = vpop.f32.mrb[13].mxu1 }
 0x1f8   :  { %v4139_v33 = vadd.f32 %v4138_v5, %v4137_v29 }
 0x1fa   :  { %v2249_v22 = vadd.f32 %v4139_v33, %v2017_v12 }
 0x20d   :  { %v4172_v35 = vpop.f32.mrb[14].mxu0 }
 0x20e   :  { %v4173_v51 = vpop.f32.mrb[15].mxu0 }
 0x20f   :  { %v4174_v19 = vadd.f32 %v4173_v51, %v4172_v35 }
 0x211   :  { %v2387_v18 = vadd.f32 %v4174_v19, %v2249_v22 }
 0x216   :  { %v4207_v4 = vpop.f32.mrb[14].mxu1 }
 0x217   :  { %v4208_v21 = vpop.f32.mrb[15].mxu1 }
 0x218   :  { %v4209_v42 = vadd.f32 %v4208_v21, %v4207_v4 }
 0x21a   :  { %v2495_v55 = vadd.f32 %v4209_v42, %v2387_v18 }
 0x22d   :  { %v4242_v11 = vpop.f32.mrb[16].mxu0 }
 0x22e   :  { %v4243_v47 = vpop.f32.mrb[17].mxu0 }
 0x22f   :  { %v4244_v44 = vadd.f32 %v4243_v47, %v4242_v11 }
 0x231   :  { %v2663_v17 = vadd.f32 %v4244_v44, %v2495_v55 }
 0x236   :  { %v4277_v26 = vpop.f32.mrb[16].mxu1 }
 0x237   :  { %v4278_v28 = vpop.f32.mrb[17].mxu1 }
 0x238   :  { %v4279_v58 = vadd.f32 %v4278_v28, %v4277_v26 }
 0x23a   :  { %v2767_v8 = vadd.f32 %v4279_v58, %v2663_v17 }
 0x24d   :  { %v4312_v23 = vpop.f32.mrb[18].mxu0 }
 0x24e   :  { %v4313_v27 = vpop.f32.mrb[19].mxu0 }
 0x24f   :  { %v4314_v39 = vadd.f32 %v4313_v27, %v4312_v23 }
 0x251   :  { %v2879_v10 = vadd.f32 %v4314_v39, %v2767_v8 }
 0x256   :  { %v4347_v41 = vpop.f32.mrb[18].mxu1 }
 0x257   :  { %v4348_v24 = vpop.f32.mrb[19].mxu1 }
 0x258   :  { %v4349_v53 = vadd.f32 %v4348_v24, %v4347_v41 }
 0x25a   :  { %v3111_v48 = vadd.f32 %v4349_v53, %v2879_v10 }
 0x26d   :  { %v4382_v14 = vpop.f32.mrb[20].mxu0 }
 0x26e   :  { %v4383_v56 = vpop.f32.mrb[21].mxu0 }
 0x26f   :  { %v4384_v9 = vadd.f32 %v4383_v56, %v4382_v14 }
 0x271   :  { %v3249_v50 = vadd.f32 %v4384_v9, %v3111_v48 }
 0x276   :  { %v4417_v2 = vpop.f32.mrb[20].mxu1 }
 0x277   :  { %v4418_v1 = vpop.f32.mrb[21].mxu1 }
 0x278   :  { %v4419_v7 = vadd.f32 %v4418_v1, %v4417_v2 }
 0x27a   :  { %v3357_v40 = vadd.f32 %v4419_v7, %v3249_v50 }
 0x28d   :  { %v4452_v0 = vpop.f32.mrb[22].mxu0 }
 0x28e   :  { %v4453_v45 = vpop.f32.mrb[23].mxu0 }
 0x28f   :  { %v4454_v57 = vadd.f32 %v4453_v45, %v4452_v0 }
 0x291   :  { %v3525_v37 = vadd.f32 %v4454_v57, %v3357_v40 }
 0x296   :  { %v4487_v49 = vpop.f32.mrb[22].mxu1 }
 0x297   :  { %v4488_v15 = vpop.f32.mrb[23].mxu1 }
 0x298   :  { %v4489_v6 = vadd.f32 %v4488_v15, %v4487_v49 }
 0x29a   :  { %v3629_v52 = vadd.f32 %v4489_v6, %v3525_v37 }
 0x29c   :  { %3632 = vst [vmem:[#allocation7] sm:$0xff] %v3629_v52 }
 0x29d   :  { %5318 = shalt.err (!%p5315_p6)
}
 0x29e   :  { %s5319_s15 = scalar_lea.hbm %s7233_s3, 128 }
 0x29f   :  { %p5320_p7 = scmp.ne.s32.totalorder %s7233_s3, %s5319_s15  ;;  %p5323_p8 = scmp.lt.u32.totalorder %s5319_s15, %s7233_s3 }
 0x2a1   :  { %p5325_p9 = pnand %p5323_p8, %p5320_p7 }
 0x2a3   :  { %5328 = shalt.err (!%p5325_p9)
}
 0x2a4   :  { %3642 = dma.vmem_to_hbm [thread:$0]  %s3640_s11, 128, %s7233_s3, [#allocation4]  }
 0x2a5   :  { %5333 = dma.done.wait [#allocation4], 128  }
 0x2a6   :  { %5334 = vsyncadd [#allocation4], 4294967168 }
 0x2a7   :  { %3646 = vsyncpa [#allocation3], 1 }
 0x2a8   :  { %3647 = vsyncpa [#allocation6], 1 }
 0x2a9   :  { %3648 = vsyncpa [#allocation4], 1 }

</bundles_post_ra>
